<compile_context>
chip_gen: v7x
topology: tpu7x:2x2x1
jax: 0.10.0
libtpu: 0.0.40
codegen_flags: <defaults>
</compile_context>

<pallas_src>
import functools

import jax
import jax.numpy as jnp
from jax import lax
from jax.experimental import pallas as pl
from jax.experimental.pallas import tpu as pltpu


# ---------------------------------------------------------------------------
# Pallas kernel: full reverse-diffusion sampling loop + softmax (one batch block)
# ---------------------------------------------------------------------------
def _diffusion_sample_kernel(
    # scalar prefetch (SMEM)
    coefs_ref,    # (3, T) f32 rows: [a_t, b_t, sigma_t] (sigma_0 == 0)
    # VMEM inputs
    temb_ref,     # (T, t_dim) sinusoidal time embeddings
    state_ref,    # (BN, S)
    init_ref,     # (BN, A)  initial x ~ N(0, I)
    probs_ref,    # (T, BN, A) per-step gaussian noise ("probs" in p_sample)
    w1x_ref, w1t_ref, w1s_ref, b1_ref,   # model layer 1 (split matmul, no concat)
    w2_ref, b2_ref,                       # model layer 2
    w3_ref, b3_ref,                       # model output layer -> predicted epsilon
    # output
    out_ref,      # (BN, A) softmax(x_final)
    # scratch
    htemb_ref,    # VMEM (T, H) f32: hoisted time-embedding layer-1 contribution
    *, n_timesteps,
):
    # ---- loop-invariant work, hoisted out of the sequential T loop ----
    w1x = w1x_ref[...]          # bf16 matmul operands, loaded once
    w2 = w2_ref[...]
    w3 = w3_ref[...]
    b2 = b2_ref[...]            # f32 biases, loaded once
    b3 = b3_ref[...]

    # time-embedding contribution for ALL timesteps in ONE matmul
    htemb_ref[...] = jnp.dot(temb_ref[...], w1t_ref[...],
                             preferred_element_type=jnp.float32)
    # state path + layer-1 bias is loop invariant
    h_base = (jnp.dot(state_ref[...], w1s_ref[...],
                      preferred_element_type=jnp.float32) + b1_ref[...])

    def step(g, x):
        t = n_timesteps - 1 - g          # reversed(range(T))
        # ---- model(x, t, state): 3-layer ReLU MLP predicting epsilon ----
        h1 = (jnp.dot(x.astype(w1x.dtype), w1x,
                      preferred_element_type=jnp.float32)
              + h_base + htemb_ref[pl.ds(t, 1), :])
        h1 = jnp.maximum(h1, 0.0)
        h2 = jnp.dot(h1.astype(w2.dtype), w2,
                     preferred_element_type=jnp.float32) + b2
        h2 = jnp.maximum(h2, 0.0)
        eps = jnp.dot(h2.astype(w3.dtype), w3,
                      preferred_element_type=jnp.float32) + b3

        # ---- fused p_mean_variance / q_posterior / p_sample update ----
        #   x <- a_t * x - b_t * eps + sigma_t * noise_t        (sigma_0 == 0)
        a_t = coefs_ref[0, t]
        b_t = coefs_ref[1, t]
        s_t = coefs_ref[2, t]
        return a_t * x - b_t * eps + s_t * probs_ref[t]

    # x carried in vregs across steps; T is small here so fully unroll.
    x = lax.fori_loop(0, n_timesteps, step, init_ref[...], unroll=True)

    # ---- F.softmax(x, dim=-1) ----
    m = jnp.max(x, axis=-1, keepdims=True)
    e = jnp.exp(x - m)
    denom = jnp.sum(e, axis=-1, keepdims=True)
    out_ref[...] = e * pl.reciprocal(denom, approx=True)


# ---------------------------------------------------------------------------
# Plain-JAX glue: beta schedule, folded coefficients, synthetic model weights
# ---------------------------------------------------------------------------
def make_diffusion_tables(n_timesteps, t_dim):
    # linear_beta_schedule (standard DDPM linear schedule)
    betas = jnp.linspace(1e-4, 2e-2, n_timesteps, dtype=jnp.float32)
    alphas = 1.0 - betas
    ac = jnp.cumprod(alphas)
    ac_prev = jnp.concatenate([jnp.ones((1,), jnp.float32), ac[:-1]])

    sqrt_recip_ac = jnp.sqrt(1.0 / ac)
    sqrt_recipm1_ac = jnp.sqrt(1.0 / ac - 1.0)
    post_var = betas * (1.0 - ac_prev) / (1.0 - ac)
    post_logvar = jnp.log(jnp.maximum(post_var, 1e-20))
    mean_c1 = betas * jnp.sqrt(ac_prev) / (1.0 - ac)
    mean_c2 = (1.0 - ac_prev) * jnp.sqrt(alphas) / (1.0 - ac)

    # Fold posterior update into 3 per-t scalars:
    #   mean = c1*(recip*x - recipm1*eps) + c2*x  =>  a_t*x - b_t*eps
    a_t = mean_c1 * sqrt_recip_ac + mean_c2
    b_t = mean_c1 * sqrt_recipm1_ac
    sigma_t = jnp.exp(0.5 * post_logvar)
    sigma_t = sigma_t.at[0].set(0.0)          # nonzero_mask for t == 0
    coefs = jnp.stack([a_t, b_t, sigma_t], axis=0)   # (3, T)

    # sinusoidal time-embedding table for t = 0..T-1
    half = t_dim // 2
    freqs = jnp.exp(jnp.arange(half, dtype=jnp.float32)
                    * (-jnp.log(10000.0) / max(half - 1, 1)))
    args = jnp.arange(n_timesteps, dtype=jnp.float32)[:, None] * freqs[None, :]
    temb = jnp.concatenate([jnp.sin(args), jnp.cos(args)], axis=-1)  # (T, t_dim)
    return coefs, temb


def make_model_params(key, action_dim, state_dim, t_dim, hidden):
    ks = jax.random.split(key, 6)
    sc = 0.1
    return dict(
        w1x=sc * jax.random.normal(ks[0], (action_dim, hidden), jnp.float32),
        w1t=sc * jax.random.normal(ks[1], (t_dim, hidden), jnp.float32),
        w1s=sc * jax.random.normal(ks[2], (state_dim, hidden), jnp.float32),
        b1=jnp.zeros((1, hidden), jnp.float32),
        w2=sc * jax.random.normal(ks[3], (hidden, hidden), jnp.float32),
        b2=jnp.zeros((1, hidden), jnp.float32),
        w3=sc * jax.random.normal(ks[4], (hidden, action_dim), jnp.float32),
        b3=jnp.zeros((1, action_dim), jnp.float32),
    )


def diffusion_forward(state, latent_action_probs, params, coefs, temb, noise_key,
                      n_timesteps):
    B, A = latent_action_probs.shape
    S = state.shape[1]
    H = params["w2"].shape[0]
    T_DIM = params["w1t"].shape[0]

    BN = 8                                  # sublane-aligned batch block
    B_pad = ((B + BN - 1) // BN) * BN

    k_init, k_probs = jax.random.split(noise_key)
    # x = torch.randn_like(latent_action_probs); probs = randn per denoising step
    init_x = jax.random.normal(k_init, (B_pad, A), jnp.float32)
    step_noise = jax.random.normal(k_probs, (n_timesteps, B_pad, A), jnp.float32)
    state_p = jnp.zeros((B_pad, S), jnp.float32).at[:B, :].set(state)

    # bf16 operands for the in-loop matmuls (f32 accumulation in-kernel)
    w1x = params["w1x"].astype(jnp.bfloat16)
    w2 = params["w2"].astype(jnp.bfloat16)
    w3 = params["w3"].astype(jnp.bfloat16)

    kernel = functools.partial(_diffusion_sample_kernel, n_timesteps=n_timesteps)

    def inv(i, _coefs):            # grid-invariant (weights / tables)
        return (0, 0)

    grid_spec = pltpu.PrefetchScalarGridSpec(
        num_scalar_prefetch=1,     # coefs -> SMEM
        grid=(B_pad // BN,),       # batch blocks, independent -> "parallel"
        in_specs=[
            pl.BlockSpec((n_timesteps, T_DIM), inv),                     # temb
            pl.BlockSpec((BN, S), lambda i, c: (i, 0)),                  # state
            pl.BlockSpec((BN, A), lambda i, c: (i, 0)),                  # init x
            pl.BlockSpec((n_timesteps, BN, A), lambda i, c: (0, i, 0)),  # noise
            pl.BlockSpec((A, H), inv),                                   # w1x
            pl.BlockSpec((T_DIM, H), inv),                               # w1t
            pl.BlockSpec((S, H), inv),                                   # w1s
            pl.BlockSpec((1, H), inv),                                   # b1
            pl.BlockSpec((H, H), inv),                                   # w2
            pl.BlockSpec((1, H), inv),                                   # b2
            pl.BlockSpec((H, A), inv),                                   # w3
            pl.BlockSpec((1, A), inv),                                   # b3
        ],
        out_specs=pl.BlockSpec((BN, A), lambda i, c: (i, 0)),
        scratch_shapes=[pltpu.VMEM((n_timesteps, H), jnp.float32)],
    )

    out = pl.pallas_call(
        kernel,
        grid_spec=grid_spec,
        out_shape=jax.ShapeDtypeStruct((B_pad, A), jnp.float32),
        compiler_params=pltpu.CompilerParams(
            dimension_semantics=("parallel",)),
    )(coefs, temb, state_p, init_x, step_noise,
      w1x, params["w1t"], params["w1s"], params["b1"],
      w2, params["b2"], w3, params["b3"])
    return out[:B]


# ---------------------------------------------------------------------------
if __name__ == "__main__":
    B = 2
    STATE_DIM = 16
    ACTION_DIM = 8
    HIDDEN = 128          # lane-dense hidden width (multiple of 128)
    T_DIM = 16
    N_TIMESTEPS = 5

    key = jax.random.PRNGKey(0)
    k_state, k_lap, k_params, k_noise = jax.random.split(key, 4)

    state = jax.random.normal(k_state, (B, STATE_DIM), jnp.float32)
    latent_action_probs = jax.random.normal(k_lap, (B, ACTION_DIM), jnp.float32)

    coefs, temb = make_diffusion_tables(N_TIMESTEPS, T_DIM)
    params = make_model_params(k_params, ACTION_DIM, STATE_DIM, T_DIM, HIDDEN)

    out = diffusion_forward(state, latent_action_probs, params, coefs, temb,
                            k_noise, N_TIMESTEPS)
    out = jax.block_until_ready(out)

    assert out.shape == (B, ACTION_DIM)
    assert bool(jnp.all(jnp.isfinite(out)))
    # softmax rows should sum to ~1 (approx reciprocal -> loose tolerance)
    assert bool(jnp.allclose(jnp.sum(out, axis=-1), 1.0, atol=5e-3))
    print("KERNEL_OK")
</pallas_src>

<mosaic_0001>
module attributes {stable_mosaic.version = 11 : i64} {
  func.func @_diffusion_sample_kernel(%arg0: i32, %arg1: memref<3x5xf32, #tpu.memory_space<smem>>, %arg2: memref<5x16xf32, #tpu.memory_space<vmem>>, %arg3: memref<8x16xf32, #tpu.memory_space<vmem>>, %arg4: memref<8x8xf32, #tpu.memory_space<vmem>>, %arg5: memref<5x8x8xf32, #tpu.memory_space<vmem>>, %arg6: memref<8x128xbf16, #tpu.memory_space<vmem>>, %arg7: memref<16x128xf32, #tpu.memory_space<vmem>>, %arg8: memref<16x128xf32, #tpu.memory_space<vmem>>, %arg9: memref<1x128xf32, #tpu.memory_space<vmem>>, %arg10: memref<128x128xbf16, #tpu.memory_space<vmem>>, %arg11: memref<1x128xf32, #tpu.memory_space<vmem>>, %arg12: memref<128x8xbf16, #tpu.memory_space<vmem>>, %arg13: memref<1x8xf32, #tpu.memory_space<vmem>>, %arg14: memref<8x8xf32, #tpu.memory_space<vmem>>, %arg15: memref<5x128xf32, #tpu.memory_space<vmem>>) attributes {dimension_semantics = [#tpu.dimension_semantics<parallel>], iteration_bounds = array<i64: 1>, scalar_prefetch = 1 : i64, scratch_operands = 1 : i64, tpu.core_type = #tpu.core_type<tc>, window_params = [{pipeline_mode = #tpu.pipeline_mode<synchronous>, transform_indices = @transform_0, window_bounds = array<i64: 5, 16>}, {transform_indices = @transform_1, window_bounds = array<i64: 8, 16>}, {transform_indices = @transform_2, window_bounds = array<i64: 8, 8>}, {transform_indices = @transform_3, window_bounds = array<i64: 5, 8, 8>}, {pipeline_mode = #tpu.pipeline_mode<synchronous>, transform_indices = @transform_4, window_bounds = array<i64: 8, 128>}, {pipeline_mode = #tpu.pipeline_mode<synchronous>, transform_indices = @transform_5, window_bounds = array<i64: 16, 128>}, {pipeline_mode = #tpu.pipeline_mode<synchronous>, transform_indices = @transform_6, window_bounds = array<i64: 16, 128>}, {pipeline_mode = #tpu.pipeline_mode<synchronous>, transform_indices = @transform_7, window_bounds = array<i64: 1, 128>}, {pipeline_mode = #tpu.pipeline_mode<synchronous>, transform_indices = @transform_8, window_bounds = array<i64: 128, 128>}, {pipeline_mode = #tpu.pipeline_mode<synchronous>, transform_indices = @transform_9, window_bounds = array<i64: 1, 128>}, {pipeline_mode = #tpu.pipeline_mode<synchronous>, transform_indices = @transform_10, window_bounds = array<i64: 128, 8>}, {pipeline_mode = #tpu.pipeline_mode<synchronous>, transform_indices = @transform_11, window_bounds = array<i64: 1, 8>}, {transform_indices = @transform_12, window_bounds = array<i64: 8, 8>}]} {
    %c0 = arith.constant 0 : index
    %c0_0 = arith.constant 0 : index
    %0 = vector.load %arg6[%c0, %c0_0] : memref<8x128xbf16, #tpu.memory_space<vmem>>, vector<8x128xbf16>
    %c0_1 = arith.constant 0 : index
    %c0_2 = arith.constant 0 : index
    %1 = vector.load %arg10[%c0_1, %c0_2] : memref<128x128xbf16, #tpu.memory_space<vmem>>, vector<128x128xbf16>
    %c0_3 = arith.constant 0 : index
    %c0_4 = arith.constant 0 : index
    %2 = vector.load %arg12[%c0_3, %c0_4] : memref<128x8xbf16, #tpu.memory_space<vmem>>, vector<128x8xbf16>
    %c0_5 = arith.constant 0 : index
    %c0_6 = arith.constant 0 : index
    %3 = vector.load %arg11[%c0_5, %c0_6] : memref<1x128xf32, #tpu.memory_space<vmem>>, vector<1x128xf32>
    %c0_7 = arith.constant 0 : index
    %c0_8 = arith.constant 0 : index
    %4 = vector.load %arg13[%c0_7, %c0_8] : memref<1x8xf32, #tpu.memory_space<vmem>>, vector<1x8xf32>
    %c0_9 = arith.constant 0 : index
    %c0_10 = arith.constant 0 : index
    %5 = vector.load %arg2[%c0_9, %c0_10] : memref<5x16xf32, #tpu.memory_space<vmem>>, vector<5x16xf32>
    %c0_11 = arith.constant 0 : index
    %c0_12 = arith.constant 0 : index
    %6 = vector.load %arg7[%c0_11, %c0_12] : memref<16x128xf32, #tpu.memory_space<vmem>>, vector<16x128xf32>
    %cst = arith.constant dense<0.000000e+00> : vector<5x128xf32>
    %7 = tpu.matmul %5, %6, %cst {dimension_numbers = #tpu.dot_dimension_numbers<[1], [0], [0], [1], [0, 0, 1, 1], [], []>} : vector<5x16xf32>, vector<16x128xf32>, vector<5x128xf32> -> vector<5x128xf32>
    %c0_13 = arith.constant 0 : index
    %c0_14 = arith.constant 0 : index
    %8 = vector.load %arg15[%c0_13, %c0_14] : memref<5x128xf32, #tpu.memory_space<vmem>>, vector<5x128xf32>
    tpu.vector_store %arg15[%c0_13, %c0_14], %7 {strides = array<i32>} : memref<5x128xf32, #tpu.memory_space<vmem>>, vector<5x128xf32>,
    %c0_15 = arith.constant 0 : index
    %c0_16 = arith.constant 0 : index
    %9 = vector.load %arg3[%c0_15, %c0_16] : memref<8x16xf32, #tpu.memory_space<vmem>>, vector<8x16xf32>
    %c0_17 = arith.constant 0 : index
    %c0_18 = arith.constant 0 : index
    %10 = vector.load %arg8[%c0_17, %c0_18] : memref<16x128xf32, #tpu.memory_space<vmem>>, vector<16x128xf32>
    %cst_19 = arith.constant dense<0.000000e+00> : vector<8x128xf32>
    %11 = tpu.matmul %9, %10, %cst_19 {dimension_numbers = #tpu.dot_dimension_numbers<[1], [0], [0], [1], [0, 0, 1, 1], [], []>} : vector<8x16xf32>, vector<16x128xf32>, vector<8x128xf32> -> vector<8x128xf32>
    %c0_20 = arith.constant 0 : index
    %c0_21 = arith.constant 0 : index
    %12 = vector.load %arg9[%c0_20, %c0_21] : memref<1x128xf32, #tpu.memory_space<vmem>>, vector<1x128xf32>
    %13 = vector.broadcast %12 : vector<1x128xf32> to vector<8x128xf32>
    %14 = arith.addf %11, %13 : vector<8x128xf32>
    %c0_22 = arith.constant 0 : index
    %c0_23 = arith.constant 0 : index
    %15 = vector.load %arg4[%c0_22, %c0_23] : memref<8x8xf32, #tpu.memory_space<vmem>>, vector<8x8xf32>
    %c0_i32 = arith.constant 0 : i32
    %c4_i32 = arith.constant 4 : i32
    %16 = arith.subi %c4_i32, %c0_i32 : i32
    %17 = arith.truncf %15 : vector<8x8xf32> to vector<8x8xbf16>
    %cst_24 = arith.constant dense<0.000000e+00> : vector<8x128xf32>
    %18 = tpu.matmul %17, %0, %cst_24 {dimension_numbers = #tpu.dot_dimension_numbers<[1], [0], [0], [1], [0, 0, 1, 1], [], []>} : vector<8x8xbf16>, vector<8x128xbf16>, vector<8x128xf32> -> vector<8x128xf32>
    %19 = arith.addf %18, %14 : vector<8x128xf32>
    %20 = arith.index_cast %16 : i32 to index
    %c0_25 = arith.constant 0 : index
    %21 = vector.load %arg15[%20, %c0_25] : memref<5x128xf32, #tpu.memory_space<vmem>>, vector<1x128xf32>
    %22 = vector.broadcast %21 : vector<1x128xf32> to vector<8x128xf32>
    %23 = arith.addf %19, %22 : vector<8x128xf32>
    %cst_26 = arith.constant 0.000000e+00 : f32
    %24 = vector.broadcast %cst_26 : f32 to vector<8x128xf32>
    %25 = arith.maximumf %23, %24 : vector<8x128xf32>
    %26 = arith.truncf %25 : vector<8x128xf32> to vector<8x128xbf16>
    %cst_27 = arith.constant dense<0.000000e+00> : vector<8x128xf32>
    %27 = tpu.matmul %26, %1, %cst_27 {dimension_numbers = #tpu.dot_dimension_numbers<[1], [0], [0], [1], [0, 0, 1, 1], [], []>} : vector<8x128xbf16>, vector<128x128xbf16>, vector<8x128xf32> -> vector<8x128xf32>
    %28 = vector.broadcast %3 : vector<1x128xf32> to vector<8x128xf32>
    %29 = arith.addf %27, %28 : vector<8x128xf32>
    %cst_28 = arith.constant 0.000000e+00 : f32
    %30 = vector.broadcast %cst_28 : f32 to vector<8x128xf32>
    %31 = arith.maximumf %29, %30 : vector<8x128xf32>
    %32 = arith.truncf %31 : vector<8x128xf32> to vector<8x128xbf16>
    %cst_29 = arith.constant dense<0.000000e+00> : vector<8x8xf32>
    %33 = tpu.matmul %32, %2, %cst_29 {dimension_numbers = #tpu.dot_dimension_numbers<[1], [0], [0], [1], [0, 0, 1, 1], [], []>} : vector<8x128xbf16>, vector<128x8xbf16>, vector<8x8xf32> -> vector<8x8xf32>
    %34 = vector.broadcast %4 : vector<1x8xf32> to vector<8x8xf32>
    %35 = arith.addf %33, %34 : vector<8x8xf32>
    %c0_30 = arith.constant 0 : index
    %36 = arith.index_cast %16 : i32 to index
    %37 = memref.load %arg1[%c0_30, %36] : memref<3x5xf32, #tpu.memory_space<smem>>
    %c1 = arith.constant 1 : index
    %38 = arith.index_cast %16 : i32 to index
    %39 = memref.load %arg1[%c1, %38] : memref<3x5xf32, #tpu.memory_space<smem>>
    %c2 = arith.constant 2 : index
    %40 = arith.index_cast %16 : i32 to index
    %41 = memref.load %arg1[%c2, %40] : memref<3x5xf32, #tpu.memory_space<smem>>
    %42 = vector.broadcast %37 : f32 to vector<8x8xf32>
    %43 = arith.mulf %42, %15 : vector<8x8xf32>
    %44 = vector.broadcast %39 : f32 to vector<8x8xf32>
    %45 = arith.mulf %44, %35 : vector<8x8xf32>
    %46 = arith.subf %43, %45 : vector<8x8xf32>
    %47 = arith.index_cast %16 : i32 to index
    %c0_31 = arith.constant 0 : index
    %c0_32 = arith.constant 0 : index
    %48 = vector.load %arg5[%47, %c0_31, %c0_32] : memref<5x8x8xf32, #tpu.memory_space<vmem>>, vector<1x8x8xf32>
    %49 = vector.shape_cast %48 : vector<1x8x8xf32> to vector<8x8xf32>
    %50 = vector.broadcast %41 : f32 to vector<8x8xf32>
    %51 = arith.mulf %50, %49 : vector<8x8xf32>
    %52 = arith.addf %46, %51 : vector<8x8xf32>
    %c1_i32 = arith.constant 1 : i32
    %c4_i32_33 = arith.constant 4 : i32
    %53 = arith.subi %c4_i32_33, %c1_i32 : i32
    %54 = arith.truncf %52 : vector<8x8xf32> to vector<8x8xbf16>
    %cst_34 = arith.constant dense<0.000000e+00> : vector<8x128xf32>
    %55 = tpu.matmul %54, %0, %cst_34 {dimension_numbers = #tpu.dot_dimension_numbers<[1], [0], [0], [1], [0, 0, 1, 1], [], []>} : vector<8x8xbf16>, vector<8x128xbf16>, vector<8x128xf32> -> vector<8x128xf32>
    %56 = arith.addf %55, %14 : vector<8x128xf32>
    %57 = arith.index_cast %53 : i32 to index
    %c0_35 = arith.constant 0 : index
    %58 = vector.load %arg15[%57, %c0_35] : memref<5x128xf32, #tpu.memory_space<vmem>>, vector<1x128xf32>
    %59 = vector.broadcast %58 : vector<1x128xf32> to vector<8x128xf32>
    %60 = arith.addf %56, %59 : vector<8x128xf32>
    %cst_36 = arith.constant 0.000000e+00 : f32
    %61 = vector.broadcast %cst_36 : f32 to vector<8x128xf32>
    %62 = arith.maximumf %60, %61 : vector<8x128xf32>
    %63 = arith.truncf %62 : vector<8x128xf32> to vector<8x128xbf16>
    %cst_37 = arith.constant dense<0.000000e+00> : vector<8x128xf32>
    %64 = tpu.matmul %63, %1, %cst_37 {dimension_numbers = #tpu.dot_dimension_numbers<[1], [0], [0], [1], [0, 0, 1, 1], [], []>} : vector<8x128xbf16>, vector<128x128xbf16>, vector<8x128xf32> -> vector<8x128xf32>
    %65 = vector.broadcast %3 : vector<1x128xf32> to vector<8x128xf32>
    %66 = arith.addf %64, %65 : vector<8x128xf32>
    %cst_38 = arith.constant 0.000000e+00 : f32
    %67 = vector.broadcast %cst_38 : f32 to vector<8x128xf32>
    %68 = arith.maximumf %66, %67 : vector<8x128xf32>
    %69 = arith.truncf %68 : vector<8x128xf32> to vector<8x128xbf16>
    %cst_39 = arith.constant dense<0.000000e+00> : vector<8x8xf32>
    %70 = tpu.matmul %69, %2, %cst_39 {dimension_numbers = #tpu.dot_dimension_numbers<[1], [0], [0], [1], [0, 0, 1, 1], [], []>} : vector<8x128xbf16>, vector<128x8xbf16>, vector<8x8xf32> -> vector<8x8xf32>
    %71 = vector.broadcast %4 : vector<1x8xf32> to vector<8x8xf32>
    %72 = arith.addf %70, %71 : vector<8x8xf32>
    %c0_40 = arith.constant 0 : index
    %73 = arith.index_cast %53 : i32 to index
    %74 = memref.load %arg1[%c0_40, %73] : memref<3x5xf32, #tpu.memory_space<smem>>
    %c1_41 = arith.constant 1 : index
    %75 = arith.index_cast %53 : i32 to index
    %76 = memref.load %arg1[%c1_41, %75] : memref<3x5xf32, #tpu.memory_space<smem>>
    %c2_42 = arith.constant 2 : index
    %77 = arith.index_cast %53 : i32 to index
    %78 = memref.load %arg1[%c2_42, %77] : memref<3x5xf32, #tpu.memory_space<smem>>
    %79 = vector.broadcast %74 : f32 to vector<8x8xf32>
    %80 = arith.mulf %79, %52 : vector<8x8xf32>
    %81 = vector.broadcast %76 : f32 to vector<8x8xf32>
    %82 = arith.mulf %81, %72 : vector<8x8xf32>
    %83 = arith.subf %80, %82 : vector<8x8xf32>
    %84 = arith.index_cast %53 : i32 to index
    %c0_43 = arith.constant 0 : index
    %c0_44 = arith.constant 0 : index
    %85 = vector.load %arg5[%84, %c0_43, %c0_44] : memref<5x8x8xf32, #tpu.memory_space<vmem>>, vector<1x8x8xf32>
    %86 = vector.shape_cast %85 : vector<1x8x8xf32> to vector<8x8xf32>
    %87 = vector.broadcast %78 : f32 to vector<8x8xf32>
    %88 = arith.mulf %87, %86 : vector<8x8xf32>
    %89 = arith.addf %83, %88 : vector<8x8xf32>
    %c2_i32 = arith.constant 2 : i32
    %c4_i32_45 = arith.constant 4 : i32
    %90 = arith.subi %c4_i32_45, %c2_i32 : i32
    %91 = arith.truncf %89 : vector<8x8xf32> to vector<8x8xbf16>
    %cst_46 = arith.constant dense<0.000000e+00> : vector<8x128xf32>
    %92 = tpu.matmul %91, %0, %cst_46 {dimension_numbers = #tpu.dot_dimension_numbers<[1], [0], [0], [1], [0, 0, 1, 1], [], []>} : vector<8x8xbf16>, vector<8x128xbf16>, vector<8x128xf32> -> vector<8x128xf32>
    %93 = arith.addf %92, %14 : vector<8x128xf32>
    %94 = arith.index_cast %90 : i32 to index
    %c0_47 = arith.constant 0 : index
    %95 = vector.load %arg15[%94, %c0_47] : memref<5x128xf32, #tpu.memory_space<vmem>>, vector<1x128xf32>
    %96 = vector.broadcast %95 : vector<1x128xf32> to vector<8x128xf32>
    %97 = arith.addf %93, %96 : vector<8x128xf32>
    %cst_48 = arith.constant 0.000000e+00 : f32
    %98 = vector.broadcast %cst_48 : f32 to vector<8x128xf32>
    %99 = arith.maximumf %97, %98 : vector<8x128xf32>
    %100 = arith.truncf %99 : vector<8x128xf32> to vector<8x128xbf16>
    %cst_49 = arith.constant dense<0.000000e+00> : vector<8x128xf32>
    %101 = tpu.matmul %100, %1, %cst_49 {dimension_numbers = #tpu.dot_dimension_numbers<[1], [0], [0], [1], [0, 0, 1, 1], [], []>} : vector<8x128xbf16>, vector<128x128xbf16>, vector<8x128xf32> -> vector<8x128xf32>
    %102 = vector.broadcast %3 : vector<1x128xf32> to vector<8x128xf32>
    %103 = arith.addf %101, %102 : vector<8x128xf32>
    %cst_50 = arith.constant 0.000000e+00 : f32
    %104 = vector.broadcast %cst_50 : f32 to vector<8x128xf32>
    %105 = arith.maximumf %103, %104 : vector<8x128xf32>
    %106 = arith.truncf %105 : vector<8x128xf32> to vector<8x128xbf16>
    %cst_51 = arith.constant dense<0.000000e+00> : vector<8x8xf32>
    %107 = tpu.matmul %106, %2, %cst_51 {dimension_numbers = #tpu.dot_dimension_numbers<[1], [0], [0], [1], [0, 0, 1, 1], [], []>} : vector<8x128xbf16>, vector<128x8xbf16>, vector<8x8xf32> -> vector<8x8xf32>
    %108 = vector.broadcast %4 : vector<1x8xf32> to vector<8x8xf32>
    %109 = arith.addf %107, %108 : vector<8x8xf32>
    %c0_52 = arith.constant 0 : index
    %110 = arith.index_cast %90 : i32 to index
    %111 = memref.load %arg1[%c0_52, %110] : memref<3x5xf32, #tpu.memory_space<smem>>
    %c1_53 = arith.constant 1 : index
    %112 = arith.index_cast %90 : i32 to index
    %113 = memref.load %arg1[%c1_53, %112] : memref<3x5xf32, #tpu.memory_space<smem>>
    %c2_54 = arith.constant 2 : index
    %114 = arith.index_cast %90 : i32 to index
    %115 = memref.load %arg1[%c2_54, %114] : memref<3x5xf32, #tpu.memory_space<smem>>
    %116 = vector.broadcast %111 : f32 to vector<8x8xf32>
    %117 = arith.mulf %116, %89 : vector<8x8xf32>
    %118 = vector.broadcast %113 : f32 to vector<8x8xf32>
    %119 = arith.mulf %118, %109 : vector<8x8xf32>
    %120 = arith.subf %117, %119 : vector<8x8xf32>
    %121 = arith.index_cast %90 : i32 to index
    %c0_55 = arith.constant 0 : index
    %c0_56 = arith.constant 0 : index
    %122 = vector.load %arg5[%121, %c0_55, %c0_56] : memref<5x8x8xf32, #tpu.memory_space<vmem>>, vector<1x8x8xf32>
    %123 = vector.shape_cast %122 : vector<1x8x8xf32> to vector<8x8xf32>
    %124 = vector.broadcast %115 : f32 to vector<8x8xf32>
    %125 = arith.mulf %124, %123 : vector<8x8xf32>
    %126 = arith.addf %120, %125 : vector<8x8xf32>
    %c3_i32 = arith.constant 3 : i32
    %c4_i32_57 = arith.constant 4 : i32
    %127 = arith.subi %c4_i32_57, %c3_i32 : i32
    %128 = arith.truncf %126 : vector<8x8xf32> to vector<8x8xbf16>
    %cst_58 = arith.constant dense<0.000000e+00> : vector<8x128xf32>
    %129 = tpu.matmul %128, %0, %cst_58 {dimension_numbers = #tpu.dot_dimension_numbers<[1], [0], [0], [1], [0, 0, 1, 1], [], []>} : vector<8x8xbf16>, vector<8x128xbf16>, vector<8x128xf32> -> vector<8x128xf32>
    %130 = arith.addf %129, %14 : vector<8x128xf32>
    %131 = arith.index_cast %127 : i32 to index
    %c0_59 = arith.constant 0 : index
    %132 = vector.load %arg15[%131, %c0_59] : memref<5x128xf32, #tpu.memory_space<vmem>>, vector<1x128xf32>
    %133 = vector.broadcast %132 : vector<1x128xf32> to vector<8x128xf32>
    %134 = arith.addf %130, %133 : vector<8x128xf32>
    %cst_60 = arith.constant 0.000000e+00 : f32
    %135 = vector.broadcast %cst_60 : f32 to vector<8x128xf32>
    %136 = arith.maximumf %134, %135 : vector<8x128xf32>
    %137 = arith.truncf %136 : vector<8x128xf32> to vector<8x128xbf16>
    %cst_61 = arith.constant dense<0.000000e+00> : vector<8x128xf32>
    %138 = tpu.matmul %137, %1, %cst_61 {dimension_numbers = #tpu.dot_dimension_numbers<[1], [0], [0], [1], [0, 0, 1, 1], [], []>} : vector<8x128xbf16>, vector<128x128xbf16>, vector<8x128xf32> -> vector<8x128xf32>
    %139 = vector.broadcast %3 : vector<1x128xf32> to vector<8x128xf32>
    %140 = arith.addf %138, %139 : vector<8x128xf32>
    %cst_62 = arith.constant 0.000000e+00 : f32
    %141 = vector.broadcast %cst_62 : f32 to vector<8x128xf32>
    %142 = arith.maximumf %140, %141 : vector<8x128xf32>
    %143 = arith.truncf %142 : vector<8x128xf32> to vector<8x128xbf16>
    %cst_63 = arith.constant dense<0.000000e+00> : vector<8x8xf32>
    %144 = tpu.matmul %143, %2, %cst_63 {dimension_numbers = #tpu.dot_dimension_numbers<[1], [0], [0], [1], [0, 0, 1, 1], [], []>} : vector<8x128xbf16>, vector<128x8xbf16>, vector<8x8xf32> -> vector<8x8xf32>
    %145 = vector.broadcast %4 : vector<1x8xf32> to vector<8x8xf32>
    %146 = arith.addf %144, %145 : vector<8x8xf32>
    %c0_64 = arith.constant 0 : index
    %147 = arith.index_cast %127 : i32 to index
    %148 = memref.load %arg1[%c0_64, %147] : memref<3x5xf32, #tpu.memory_space<smem>>
    %c1_65 = arith.constant 1 : index
    %149 = arith.index_cast %127 : i32 to index
    %150 = memref.load %arg1[%c1_65, %149] : memref<3x5xf32, #tpu.memory_space<smem>>
    %c2_66 = arith.constant 2 : index
    %151 = arith.index_cast %127 : i32 to index
    %152 = memref.load %arg1[%c2_66, %151] : memref<3x5xf32, #tpu.memory_space<smem>>
    %153 = vector.broadcast %148 : f32 to vector<8x8xf32>
    %154 = arith.mulf %153, %126 : vector<8x8xf32>
    %155 = vector.broadcast %150 : f32 to vector<8x8xf32>
    %156 = arith.mulf %155, %146 : vector<8x8xf32>
    %157 = arith.subf %154, %156 : vector<8x8xf32>
    %158 = arith.index_cast %127 : i32 to index
    %c0_67 = arith.constant 0 : index
    %c0_68 = arith.constant 0 : index
    %159 = vector.load %arg5[%158, %c0_67, %c0_68] : memref<5x8x8xf32, #tpu.memory_space<vmem>>, vector<1x8x8xf32>
    %160 = vector.shape_cast %159 : vector<1x8x8xf32> to vector<8x8xf32>
    %161 = vector.broadcast %152 : f32 to vector<8x8xf32>
    %162 = arith.mulf %161, %160 : vector<8x8xf32>
    %163 = arith.addf %157, %162 : vector<8x8xf32>
    %c4_i32_69 = arith.constant 4 : i32
    %c4_i32_70 = arith.constant 4 : i32
    %164 = arith.subi %c4_i32_70, %c4_i32_69 : i32
    %165 = arith.truncf %163 : vector<8x8xf32> to vector<8x8xbf16>
    %cst_71 = arith.constant dense<0.000000e+00> : vector<8x128xf32>
    %166 = tpu.matmul %165, %0, %cst_71 {dimension_numbers = #tpu.dot_dimension_numbers<[1], [0], [0], [1], [0, 0, 1, 1], [], []>} : vector<8x8xbf16>, vector<8x128xbf16>, vector<8x128xf32> -> vector<8x128xf32>
    %167 = arith.addf %166, %14 : vector<8x128xf32>
    %168 = arith.index_cast %164 : i32 to index
    %c0_72 = arith.constant 0 : index
    %169 = vector.load %arg15[%168, %c0_72] : memref<5x128xf32, #tpu.memory_space<vmem>>, vector<1x128xf32>
    %170 = vector.broadcast %169 : vector<1x128xf32> to vector<8x128xf32>
    %171 = arith.addf %167, %170 : vector<8x128xf32>
    %cst_73 = arith.constant 0.000000e+00 : f32
    %172 = vector.broadcast %cst_73 : f32 to vector<8x128xf32>
    %173 = arith.maximumf %171, %172 : vector<8x128xf32>
    %174 = arith.truncf %173 : vector<8x128xf32> to vector<8x128xbf16>
    %cst_74 = arith.constant dense<0.000000e+00> : vector<8x128xf32>
    %175 = tpu.matmul %174, %1, %cst_74 {dimension_numbers = #tpu.dot_dimension_numbers<[1], [0], [0], [1], [0, 0, 1, 1], [], []>} : vector<8x128xbf16>, vector<128x128xbf16>, vector<8x128xf32> -> vector<8x128xf32>
    %176 = vector.broadcast %3 : vector<1x128xf32> to vector<8x128xf32>
    %177 = arith.addf %175, %176 : vector<8x128xf32>
    %cst_75 = arith.constant 0.000000e+00 : f32
    %178 = vector.broadcast %cst_75 : f32 to vector<8x128xf32>
    %179 = arith.maximumf %177, %178 : vector<8x128xf32>
    %180 = arith.truncf %179 : vector<8x128xf32> to vector<8x128xbf16>
    %cst_76 = arith.constant dense<0.000000e+00> : vector<8x8xf32>
    %181 = tpu.matmul %180, %2, %cst_76 {dimension_numbers = #tpu.dot_dimension_numbers<[1], [0], [0], [1], [0, 0, 1, 1], [], []>} : vector<8x128xbf16>, vector<128x8xbf16>, vector<8x8xf32> -> vector<8x8xf32>
    %182 = vector.broadcast %4 : vector<1x8xf32> to vector<8x8xf32>
    %183 = arith.addf %181, %182 : vector<8x8xf32>
    %c0_77 = arith.constant 0 : index
    %184 = arith.index_cast %164 : i32 to index
    %185 = memref.load %arg1[%c0_77, %184] : memref<3x5xf32, #tpu.memory_space<smem>>
    %c1_78 = arith.constant 1 : index
    %186 = arith.index_cast %164 : i32 to index
    %187 = memref.load %arg1[%c1_78, %186] : memref<3x5xf32, #tpu.memory_space<smem>>
    %c2_79 = arith.constant 2 : index
    %188 = arith.index_cast %164 : i32 to index
    %189 = memref.load %arg1[%c2_79, %188] : memref<3x5xf32, #tpu.memory_space<smem>>
    %190 = vector.broadcast %185 : f32 to vector<8x8xf32>
    %191 = arith.mulf %190, %163 : vector<8x8xf32>
    %192 = vector.broadcast %187 : f32 to vector<8x8xf32>
    %193 = arith.mulf %192, %183 : vector<8x8xf32>
    %194 = arith.subf %191, %193 : vector<8x8xf32>
    %195 = arith.index_cast %164 : i32 to index
    %c0_80 = arith.constant 0 : index
    %c0_81 = arith.constant 0 : index
    %196 = vector.load %arg5[%195, %c0_80, %c0_81] : memref<5x8x8xf32, #tpu.memory_space<vmem>>, vector<1x8x8xf32>
    %197 = vector.shape_cast %196 : vector<1x8x8xf32> to vector<8x8xf32>
    %198 = vector.broadcast %189 : f32 to vector<8x8xf32>
    %199 = arith.mulf %198, %197 : vector<8x8xf32>
    %200 = arith.addf %194, %199 : vector<8x8xf32>
    %c5_i32 = arith.constant 5 : i32
    %cst_82 = arith.constant dense<0xFF800000> : vector<8xf32>
    %201 = vector.multi_reduction <maximumf>, %200, %cst_82 [1] : vector<8x8xf32> to vector<8xf32>
    %202 = vector.shape_cast %201 : vector<8xf32> to vector<8x1xf32>
    %203 = vector.broadcast %202 : vector<8x1xf32> to vector<8x8xf32>
    %204 = arith.subf %200, %203 : vector<8x8xf32>
    %205 = math.exp %204 : vector<8x8xf32>
    %cst_83 = arith.constant dense<0.000000e+00> : vector<8xf32>
    %206 = vector.multi_reduction <add>, %205, %cst_83 [1] : vector<8x8xf32> to vector<8xf32>
    %207 = vector.shape_cast %206 : vector<8xf32> to vector<8x1xf32>
    %208 = tpu.reciprocal %207 {approx = true} : vector<8x1xf32> -> vector<8x1xf32>
    %209 = vector.broadcast %208 : vector<8x1xf32> to vector<8x8xf32>
    %210 = arith.mulf %205, %209 : vector<8x8xf32>
    %c0_84 = arith.constant 0 : index
    %c0_85 = arith.constant 0 : index
    %211 = vector.load %arg14[%c0_84, %c0_85] : memref<8x8xf32, #tpu.memory_space<vmem>>, vector<8x8xf32>
    tpu.vector_store %arg14[%c0_84, %c0_85], %210 {strides = array<i32>} : memref<8x8xf32, #tpu.memory_space<vmem>>, vector<8x8xf32>,
    return
  }
  func.func @transform_0(%arg0: i32, %arg1: memref<3x5xf32, #tpu.memory_space<smem>>) -> (i32, i32) {
    %c0_i32 = arith.constant 0 : i32
    %c0_i32_0 = arith.constant 0 : i32
    %c0_i32_1 = arith.constant 0 : i32
    return %c0_i32, %c0_i32_0 : i32, i32
  }
  func.func @transform_1(%arg0: i32, %arg1: memref<3x5xf32, #tpu.memory_space<smem>>) -> (i32, i32) {
    %c0_i32 = arith.constant 0 : i32
    %c0_i32_0 = arith.constant 0 : i32
    return %arg0, %c0_i32 : i32, i32
  }
  func.func @transform_2(%arg0: i32, %arg1: memref<3x5xf32, #tpu.memory_space<smem>>) -> (i32, i32) {
    %c0_i32 = arith.constant 0 : i32
    %c0_i32_0 = arith.constant 0 : i32
    return %arg0, %c0_i32 : i32, i32
  }
  func.func @transform_3(%arg0: i32, %arg1: memref<3x5xf32, #tpu.memory_space<smem>>) -> (i32, i32, i32) {
    %c0_i32 = arith.constant 0 : i32
    %c0_i32_0 = arith.constant 0 : i32
    %c0_i32_1 = arith.constant 0 : i32
    return %c0_i32, %arg0, %c0_i32_0 : i32, i32, i32
  }
  func.func @transform_4(%arg0: i32, %arg1: memref<3x5xf32, #tpu.memory_space<smem>>) -> (i32, i32) {
    %c0_i32 = arith.constant 0 : i32
    %c0_i32_0 = arith.constant 0 : i32
    %c0_i32_1 = arith.constant 0 : i32
    return %c0_i32, %c0_i32_0 : i32, i32
  }
  func.func @transform_5(%arg0: i32, %arg1: memref<3x5xf32, #tpu.memory_space<smem>>) -> (i32, i32) {
    %c0_i32 = arith.constant 0 : i32
    %c0_i32_0 = arith.constant 0 : i32
    %c0_i32_1 = arith.constant 0 : i32
    return %c0_i32, %c0_i32_0 : i32, i32
  }
  func.func @transform_6(%arg0: i32, %arg1: memref<3x5xf32, #tpu.memory_space<smem>>) -> (i32, i32) {
    %c0_i32 = arith.constant 0 : i32
    %c0_i32_0 = arith.constant 0 : i32
    %c0_i32_1 = arith.constant 0 : i32
    return %c0_i32, %c0_i32_0 : i32, i32
  }
  func.func @transform_7(%arg0: i32, %arg1: memref<3x5xf32, #tpu.memory_space<smem>>) -> (i32, i32) {
    %c0_i32 = arith.constant 0 : i32
    %c0_i32_0 = arith.constant 0 : i32
    %c0_i32_1 = arith.constant 0 : i32
    return %c0_i32, %c0_i32_0 : i32, i32
  }
  func.func @transform_8(%arg0: i32, %arg1: memref<3x5xf32, #tpu.memory_space<smem>>) -> (i32, i32) {
    %c0_i32 = arith.constant 0 : i32
    %c0_i32_0 = arith.constant 0 : i32
    %c0_i32_1 = arith.constant 0 : i32
    return %c0_i32, %c0_i32_0 : i32, i32
  }
  func.func @transform_9(%arg0: i32, %arg1: memref<3x5xf32, #tpu.memory_space<smem>>) -> (i32, i32) {
    %c0_i32 = arith.constant 0 : i32
    %c0_i32_0 = arith.constant 0 : i32
    %c0_i32_1 = arith.constant 0 : i32
    return %c0_i32, %c0_i32_0 : i32, i32
  }
  func.func @transform_10(%arg0: i32, %arg1: memref<3x5xf32, #tpu.memory_space<smem>>) -> (i32, i32) {
    %c0_i32 = arith.constant 0 : i32
    %c0_i32_0 = arith.constant 0 : i32
    %c0_i32_1 = arith.constant 0 : i32
    return %c0_i32, %c0_i32_0 : i32, i32
  }
  func.func @transform_11(%arg0: i32, %arg1: memref<3x5xf32, #tpu.memory_space<smem>>) -> (i32, i32) {
    %c0_i32 = arith.constant 0 : i32
    %c0_i32_0 = arith.constant 0 : i32
    %c0_i32_1 = arith.constant 0 : i32
    return %c0_i32, %c0_i32_0 : i32, i32
  }
  func.func @transform_12(%arg0: i32, %arg1: memref<3x5xf32, #tpu.memory_space<smem>>) -> (i32, i32) {
    %c0_i32 = arith.constant 0 : i32
    %c0_i32_0 = arith.constant 0 : i32
    return %arg0, %c0_i32 : i32, i32
  }
}

</mosaic_0001>

<bundles_post_ra>
// kernel: tpu_custom_call.1
= control target key start
LH: loop header
LB: loop body
LE: loop exit
PB: predicated region body
PF: predicated region fallthrough
CT: control target
= control target key end

     0   :  { %s2338_s0 = inlined_call_operand.vmem [shape: f32[3,5], index: 0, kind: input, shape index: {}]   ;;  %s2339_s1 = inlined_call_operand.hbm [shape: f32[5,16], index: 1, kind: input, shape index: {}]   ;;  %s2340_s2 = inlined_call_operand.hbm [shape: f32[8,16], index: 2, kind: input, shape index: {}]   ;;  %s2341_s3 = inlined_call_operand.hbm [shape: f32[8,8], index: 3, kind: input, shape index: {}]   ;;  %s2342_s4 = inlined_call_operand.hbm [shape: f32[5,8,8], index: 4, kind: input, shape index: {}]   ;;  %s2343_s5 = inlined_call_operand.hbm [shape: bf16[8,128], index: 5, kind: input, shape index: {}]   ;;  %s2344_s6 = inlined_call_operand.vmem [shape: f32[16,128], index: 6, kind: input, shape index: {}]   ;;  %s2345_s7 = inlined_call_operand.vmem [shape: f32[16,128], index: 7, kind: input, shape index: {}]   ;;  %s2346_s8 = inlined_call_operand.vmem [shape: f32[1,128], index: 8, kind: input, shape index: {}]   ;;  %s2347_s9 = inlined_call_operand.vmem [shape: bf16[128,128], index: 9, kind: input, shape index: {}]   ;;  %s2348_s10 = inlined_call_operand.hbm [shape: f32[1,128], index: 10, kind: input, shape index: {}]   ;;  %s2349_s11 = inlined_call_operand.vmem [shape: bf16[128,8], index: 11, kind: input, shape index: {}]   ;;  %s2350_s12 = inlined_call_operand.vmem [shape: f32[1,8], index: 12, kind: input, shape index: {}]   ;;  %s2351_s13 = inlined_call_operand.hbm [shape: f32[8,8], index: 13, kind: output, shape index: {}]  }
   0x1   :  { %s18_s27 = sshll.u32 %s2338_s0, 4  ;;  %s19_s27 = int_to_ptr.vmem [resolvable:$true] %s18_s27 }
   0x2   :  { %s1630_s28 = scalar_lea.vmem %s19_s27, 64  ;;  %p1635_p1 = scmp.lt.s32.totalorder %s19_s27, %s19_s27 }
   0x3   :  { %p1631_p0 = scmp.ne.s32.totalorder %s19_s27, %s1630_s28  ;;  %p1636_p2 = scmp.lt.s32.totalorder %s1630_s28, %s1630_s28 }
   0x5   :  { %p1637_p3 = por %p1636_p2, %p1635_p1 }
   0x7   :  { %p1638_p4 = pnand %p1637_p3, %p1631_p0 }
   0x9   :  { %1641 = shalt.err (!%p1638_p4)  }
   0xa   :  { %s1808_s29 = smov [#allocation4]  }
   0xb   :  { %21 = dma.vmem_to_smem %s19_s27, 64, %s1808_s29, [#allocation3] }
   0xc   :  { %1796 = dma.done.wait [#allocation3], 64 }
   0xd   :  { %1797 = vsyncadd [#allocation3], 4294967232 }
   0xe   :  { %23 = sfence }
   0xf   :  { %24 = vsyncpa [#allocation6], 0 }
  0x10   :  { %25 = vsyncpa [#allocation9], 0 }
  0x11   :  { %26 = vsyncpa [#allocation12], 0 }
  0x12   :  { %27 = vsyncpa [#allocation15], 0 }
  0x13   :  { %28 = vsyncpa [#allocation7], 0  ;;  %s1809_s30 = smov [#allocation8]   ;;  %s1810_s14 = smov [#allocation11]  }
  0x14   :  { %s45_s0 = sshll.u32 %s1809_s30, 4  ;;  %s64_s15 = sshll.u32 %s1810_s14, 4  ;;  %s46_s0 = int_to_ptr.vmem [resolvable:$true] %s45_s0  ;;  %s1894_s15 = int_to_ptr.vmem [resolvable:$true] %s64_s15 }
  0x15   :  { %s1642_s18 = scalar_lea.hbm %s2340_s2, 128 }
  0x16   :  { %p1643_p5 = scmp.ne.s32.totalorder %s2340_s2, %s1642_s18  ;;  %p1646_p6 = scmp.lt.u32.totalorder %s1642_s18, %s2340_s2 }
  0x18   :  { %p1648_p7 = pnand %p1646_p6, %p1643_p5 }
  0x1a   :  { %1651 = shalt.err (!%p1648_p7)
}
  0x1b   :  { %s1652_s23 = scalar_lea.vmem %s46_s0, 128  ;;  %p1657_p9 = scmp.lt.s32.totalorder %s46_s0, %s46_s0 }
  0x1c   :  { %p1653_p8 = scmp.ne.s32.totalorder %s46_s0, %s1652_s23  ;;  %p1658_p10 = scmp.lt.s32.totalorder %s1652_s23, %s1652_s23 }
  0x1e   :  { %p1659_p11 = por %p1658_p10, %p1657_p9 }
  0x20   :  { %p1660_p12 = pnand %p1659_p11, %p1653_p8 }
  0x22   :  { %1663 = shalt.err (!%p1660_p12)
}
  0x23   :  { %48 = dma.hbm_to_vmem [thread:$0]  %s2340_s2, 128, %s46_s0, [#allocation9]  }
  0x24   :  { %s1664_s28 = scalar_lea.hbm %s2342_s4, 640 }
  0x25   :  { %p1665_p13 = scmp.ne.s32.totalorder %s2342_s4, %s1664_s28  ;;  %p1668_p0 = scmp.lt.u32.totalorder %s1664_s28, %s2342_s4 }
  0x27   :  { %p1670_p1 = pnand %p1668_p0, %p1665_p13 }
  0x29   :  { %1673 = shalt.err (!%p1670_p1)
}
  0x2a   :  { %s1674_s17 = scalar_lea.vmem %s1894_s15, 640  ;;  %p1679_p3 = scmp.lt.s32.totalorder %s1894_s15, %s1894_s15 }
  0x2b   :  { %p1675_p2 = scmp.ne.s32.totalorder %s1894_s15, %s1674_s17  ;;  %p1680_p4 = scmp.lt.s32.totalorder %s1674_s17, %s1674_s17 }
  0x2d   :  { %p1681_p5 = por %p1680_p4, %p1679_p3 }
  0x2f   :  { %p1682_p6 = pnand %p1681_p5, %p1675_p2 }
  0x31   :  { %1685 = shalt.err (!%p1682_p6)
}
  0x32   :  { %s1811_s2 = smov 128   ;;  %s1812_s0 = smov 8  }
  0x33   :  { %70 = dma.hbm_to_vmem [thread:$0]  %s2342_s4, 640, %s1894_s15, [#allocation12], %s1811_s2, %s1811_s2, %s1812_s0  }
  0x34   :  { %s1813_s20 = smov [#allocation5]   ;;  %s1814_s22 = smov [#allocation10]  }
  0x35   :  { %s35_s21 = sshll.u32 %s1813_s20, 4  ;;  %s55_s23 = sshll.u32 %s1814_s22, 4  ;;  %s36_s21 = int_to_ptr.vmem [resolvable:$true] %s35_s21  ;;  %s56_s23 = int_to_ptr.vmem [resolvable:$true] %s55_s23 }
  0x36   :  { %s1686_s26 = scalar_lea.hbm %s2339_s1, 128 }
  0x37   :  { %p1687_p7 = scmp.ne.s32.totalorder %s2339_s1, %s1686_s26  ;;  %p1690_p8 = scmp.lt.u32.totalorder %s1686_s26, %s2339_s1 }
  0x39   :  { %p1692_p9 = pnand %p1690_p8, %p1687_p7 }
  0x3b   :  { %1695 = shalt.err (!%p1692_p9)
}
  0x3c   :  { %s1696_s4 = scalar_lea.vmem %s36_s21, 128  ;;  %p1701_p11 = scmp.lt.s32.totalorder %s36_s21, %s36_s21 }
  0x3d   :  { %p1697_p10 = scmp.ne.s32.totalorder %s36_s21, %s1696_s4  ;;  %p1702_p12 = scmp.lt.s32.totalorder %s1696_s4, %s1696_s4 }
  0x3f   :  { %p1703_p13 = por %p1702_p12, %p1701_p11 }
  0x41   :  { %p1704_p0 = pnand %p1703_p13, %p1697_p10 }
  0x43   :  { %1707 = shalt.err (!%p1704_p0)
}
  0x44   :  { %38 = dma.hbm_to_vmem [thread:$0]  %s2339_s1, 128, %s36_s21, [#allocation6]  }
  0x45   :  { %s1708_s2 = scalar_lea.hbm %s2341_s3, 128 }
  0x46   :  { %p1709_p1 = scmp.ne.s32.totalorder %s2341_s3, %s1708_s2  ;;  %p1712_p2 = scmp.lt.u32.totalorder %s1708_s2, %s2341_s3 }
  0x48   :  { %p1714_p3 = pnand %p1712_p2, %p1709_p1 }
  0x4a   :  { %1717 = shalt.err (!%p1714_p3)
}
  0x4b   :  { %s1718_s22 = scalar_lea.vmem %s56_s23, 128  ;;  %p1723_p5 = scmp.lt.s32.totalorder %s56_s23, %s56_s23 }
  0x4c   :  { %p1719_p4 = scmp.ne.s32.totalorder %s56_s23, %s1718_s22  ;;  %p1724_p6 = scmp.lt.s32.totalorder %s1718_s22, %s1718_s22 }
  0x4e   :  { %p1725_p7 = por %p1724_p6, %p1723_p5 }
  0x50   :  { %p1726_p8 = pnand %p1725_p7, %p1719_p4 }
  0x52   :  { %1729 = shalt.err (!%p1726_p8)
}
  0x53   :  { %58 = dma.hbm_to_vmem [thread:$0]  %s2341_s3, 128, %s56_s23, [#allocation9]  }
  0x54   :  { %s1815_s24 = smov [#allocation13]   ;;  %s1816_s26 = smov [#allocation14]  }
  0x55   :  { %s77_s25 = sshll.u32 %s1815_s24, 4  ;;  %s95_s27 = sshll.u32 %s1816_s26, 4  ;;  %s78_s25 = int_to_ptr.vmem [resolvable:$true] %s77_s25  ;;  %s96_s27 = int_to_ptr.vmem [resolvable:$true] %s95_s27 }
  0x56   :  { %s1730_s30 = scalar_lea.hbm %s2343_s5, 64 }
  0x57   :  { %p1731_p9 = scmp.ne.s32.totalorder %s2343_s5, %s1730_s30  ;;  %p1734_p10 = scmp.lt.u32.totalorder %s1730_s30, %s2343_s5 }
  0x59   :  { %p1736_p11 = pnand %p1734_p10, %p1731_p9 }
  0x5b   :  { %1739 = shalt.err (!%p1736_p11)
}
  0x5c   :  { %s1740_s3 = scalar_lea.vmem %s78_s25, 64  ;;  %p1745_p13 = scmp.lt.s32.totalorder %s78_s25, %s78_s25 }
  0x5d   :  { %p1741_p12 = scmp.ne.s32.totalorder %s78_s25, %s1740_s3  ;;  %p1746_p0 = scmp.lt.s32.totalorder %s1740_s3, %s1740_s3 }
  0x5f   :  { %p1747_p1 = por %p1746_p0, %p1745_p13 }
  0x61   :  { %p1748_p2 = pnand %p1747_p1, %p1741_p12 }
  0x63   :  { %1751 = shalt.err (!%p1748_p2)
}
  0x64   :  { %80 = dma.hbm_to_vmem [thread:$0]  %s2343_s5, 64, %s78_s25, [#allocation12]  }
  0x65   :  { %s1752_s18 = scalar_lea.hbm %s2348_s10, 16 }
  0x66   :  { %p1753_p3 = scmp.ne.s32.totalorder %s2348_s10, %s1752_s18  ;;  %p1756_p4 = scmp.lt.u32.totalorder %s1752_s18, %s2348_s10 }
  0x68   :  { %p1758_p5 = pnand %p1756_p4, %p1753_p3 }
  0x6a   :  { %1761 = shalt.err (!%p1758_p5)
}
  0x6b   :  { %s1762_s21 = scalar_lea.vmem %s96_s27, 16  ;;  %s1766_s24 = scalar_lea.vmem %s96_s27, 32 }
  0x6c   :  { %p1763_p6 = scmp.ne.s32.totalorder %s96_s27, %s1762_s21  ;;  %p1767_p7 = scmp.lt.s32.totalorder %s96_s27, %s96_s27 }
  0x6d   :  { %p1768_p8 = scmp.lt.s32.totalorder %s1766_s24, %s1762_s21 }
  0x6f   :  { %p1769_p9 = por %p1768_p8, %p1767_p7 }
  0x71   :  { %p1770_p10 = pnand %p1769_p9, %p1763_p6 }
  0x73   :  { %1773 = shalt.err (!%p1770_p10)
}
  0x74   :  { %98 = dma.hbm_to_vmem [thread:$0]  %s2348_s10, 16, %s96_s27, [#allocation15]  }
  0x75   :  { %1798 = dma.done.wait [#allocation6], 128  }
  0x76   :  { %1799 = vsyncadd [#allocation6], 4294967168 }
  0x77   :  { %1800 = dma.done.wait [#allocation9], 256  }
  0x78   :  { %1801 = vsyncadd [#allocation9], 4294967040 }
  0x79   :  { %1802 = dma.done.wait [#allocation12], 704  }
  0x7a   :  { %1803 = vsyncadd [#allocation12], 4294966592 }
  0x7b   :  { %1804 = dma.done.wait [#allocation15], 16  }
  0x7c   :  { %1805 = vsyncadd [#allocation15], 4294967280  ;;  %v1817_v0 = vmov 0.0|0.0   ;;  %vm1818_vm0 = vmmov 0   ;;  %v1819_v1 = vmov 0.0   ;;  %v158_v2 = vld [vmem:[%s2344_s6] sm:$0xff] }
  0x7d   :  { %1591 = vmatprep.subr.bf16.mxu0 %v1817_v0  ;;  %1351 = vmatprep.mubr.msk.f32.mxu0 %vm1818_vm0, %v1819_v1  ;;  %v159_v3 = vld [vmem:[%s2344_s6 + $0x8] sm:$0xff]  ;;  %v236_v5 = vld [vmem:[%s2345_s7] sm:$0xff]  ;;  %vm324_vm1 = vcmask 1043456   ;;  %v235_v10 = vld [vmem:[#allocation8] sm:$0xff]  ;;  %vm160_vm2 = vcmask 130048   ;;  %vm320_vm3 = vcmask 64512  }
  0x7e   :  { %1594 = vmatprep.subr.bf16.mxu1 %v1817_v0  ;;  %1358 = vmatprep.mubr.msk.f32.mxu1 %vm1818_vm0, %v1819_v1  ;;  %v1592_v4 = vpack.c.bf16 %v159_v3, %v158_v2  ;;  %v237_v6 = vld [vmem:[%s2345_s7 + $0x8] sm:$0xff]  ;;  %v1989_v11 = vld [vmem:[#allocation10] sm:$0xff]  ;;  %v1997_v13 = vld [vmem:[%s2347_s9] sm:$0xff]   ;;  %s1220_s17 = sld [smem:[#allocation4 + $0x84]]  ;;  %s1225_s19 = sld [smem:[#allocation4 + $0x83]] }
  0x7f   :  { %v122_v7 = vld [vmem:[#allocation13] sm:$0xf]  ;;  %v1595_v9 = vpack.c.bf16 %v237_v6, %v236_v5  ;;  %v319_v14 = vpack.c.bf16 %v1989_v11, %v1989_v11  ;;  %v2018_v16 = vld [vmem:[%s2347_s9 + $0x10] sm:$0xff]   ;;  %v2029_v17 = vld [vmem:[%s2347_s9 + $0x18] sm:$0xff]   ;;  %s1221_s2 = sld [smem:[#allocation4 + $0x104]]  ;;  %s1226_s20 = sld [smem:[#allocation4 + $0x103]] }
  0x80   :  { %v157_v8 = vld [vmem:[#allocation5] sm:$0x1f]  ;;  %1593 = vmatpush3.bf16.msra.mxu0 %v1592_v4  ;;  %v1992_v12 = vsel %vm324_vm1, %v122_v7, 0  ;;  %v2037_v18 = vld [vmem:[%s2347_s9 + $0x20] sm:$0xff]   ;;  %v2051_v20 = vld [vmem:[%s2347_s9 + $0x30] sm:$0xff]   ;;  %s1229_s22 = sld [smem:[#allocation4 + $0x2]] }
  0x81   :  { %1596 = vmatpush3.bf16.msra.mxu1 %v1595_v9  ;;  %1361 = vmatprep.subr.bf16.mxu0 %v1819_v1  ;;  %v2005_v15 = vld [vmem:[%s2347_s9 + $0x8] sm:$0xff]   ;;  %v2058_v21 = vld [vmem:[%s2347_s9 + $0x38] sm:$0xff]   ;;  %v2065_v22 = vld [vmem:[%s2349_s11] sm:$0xff]   ;;  %s1230_s1 = sld [smem:[#allocation4 + $0x82]]  ;;  %s1234_s24 = sld [smem:[#allocation4 + $0x1]] }
  0x82   :  { %1367 = vmatprep.subr.bf16.mxu1 %v1819_v1  ;;  %v2044_v19 = vld [vmem:[%s2347_s9 + $0x28] sm:$0xff]   ;;  %v2078_v24 = vld [vmem:[%s2349_s11 + $0x10] sm:$0xff]   ;;  %v2085_v25 = vld [vmem:[%s2349_s11 + $0x18] sm:$0xff]   ;;  %s1231_s21 = sld [smem:[#allocation4 + $0x102]]  ;;  %s1235_s5 = sld [smem:[#allocation4 + $0x81]] }
  0x83   :  { %1352 = vmatmul.mubr.msk.f32.vlgmr.msra.gmra.mrb[0].mxu0 %vm160_vm2, %v157_v8  ;;  %v2071_v23 = vld [vmem:[%s2349_s11 + $0x8] sm:$0xff]   ;;  %v2092_v26 = vld [vmem:[%s2349_s11 + $0x20] sm:$0xff]   ;;  %v2117_v43 = vld [vmem:[%s2349_s11 + $0x30] sm:$0xff]   ;;  %s1236_s25 = sld [smem:[#allocation4 + $0x101]]  ;;  %s1154_s10 = sld [smem:[#allocation4]] }
  0x84   :  { %1362 = vmatpush3.bf16.msra.mxu0 %v1992_v12  ;;  %1359 = vmatmul.mubr.msk.f32.vlgmr.msra.gmra.mrb[0].mxu1 %vm160_vm2, %v235_v10  ;;  %v2099_v27 = vld [vmem:[%s2349_s11 + $0x28] sm:$0xff]   ;;  %v1197_v28 = vld [vmem:[%s2346_s8] ss:$0 sm:$0xff]  ;;  %v2124_v44 = vld [vmem:[%s2349_s11 + $0x38] sm:$0xff]   ;;  %s1219_s11 = sld [smem:[#allocation4 + $0x4]]  ;;  %v571_v56 = vstv %s1220_s17  ;;  %s1239_s26 = sld [smem:[#allocation4 + $0x80]] }
  0x85   :  { %1363 = vmatprep.mubr.msk.bf16.mxu0 %vm1818_vm0, %v1819_v1  ;;  %1368 = vmatpush3.bf16.msra.mxu1 %v1997_v13  ;;  %v2128_v45 = vld [vmem:[#allocation14] ss:$0 sm:$0xff]  ;;  %v2152_v53 = vld [vmem:[%s2350_s12] ss:$0 sm:$0xff]  ;;  %v576_v58 = vstv %s1221_s2  ;;  %s1224_s12 = sld [smem:[#allocation4 + $0x3]]  ;;  %s1240_s9 = sld [smem:[#allocation4 + $0x100]] }
  0x86   :  { %1369 = vmatprep.subr.bf16.mxu1 %v1819_v1  ;;  %1383 = vmatprep.mubr.msk.bf16.mxu1 %vm1818_vm0, %v1819_v1  ;;  %v575_v57 = vld [vmem:[#allocation11 + $0x20] sm:$0xff]  ;;  %s1820_s27 = smov [#allocation16]  }
  0x87   :  { %1364 = vmatmul.mubr.msk.bf16.vlgmr.msra.gmra.mrb[4].mxu0 %vm320_vm3, %v319_v14  ;;  %1387 = vmatprep.subr.bf16.mxu0 %v1819_v1  ;;  %v577_v0 = vmul.f32 %v576_v58, %v575_v57  ;;  %s1184_s28 = sshll.u32 %s1820_s27, 4  ;;  %s1185_s28 = int_to_ptr.vmem [resolvable:$true] %s1184_s28 }
  0x88   :  { %1403 = vmatprep.mubr.msk.bf16.mxu0 %vm1818_vm0, %v1819_v1  ;;  %1388 = vmatpush3.bf16.msra.mxu0 %v2065_v22  ;;  %s1774_s29 = scalar_lea.vmem %s1185_s28, 128  ;;  %p1779_p12 = scmp.lt.s32.totalorder %s1185_s28, %s1185_s28 }
  0x89   :  { %1370 = vmatpush3.bf16.msra.mxu1 %v2005_v15  ;;  %1389 = vmatprep.subr.bf16.mxu0 %v1819_v1  ;;  %p1775_p11 = scmp.ne.s32.totalorder %s1185_s28, %s1774_s29  ;;  %p1780_p13 = scmp.lt.s32.totalorder %s1774_s29, %s1774_s29 }
  0x8a   :  { %1371 = vmatprep.subr.bf16.mxu1 %v1819_v1  ;;  %v569_v54 = vstv %s1219_s11 }
  0x8b   :  { %v570_v60 = vmul.f32 %v569_v54, %v1989_v11  ;;  %p1781_p0 = por %p1780_p13, %p1779_p12 }
  0x8c   :  { %1390 = vmatpush3.bf16.msra.mxu0 %v2071_v23 }
  0x8d   :  { %1372 = vmatpush3.bf16.msra.mxu1 %v2018_v16  ;;  %1391 = vmatprep.subr.bf16.mxu0 %v1819_v1  ;;  %p1782_p1 = pnand %p1781_p0, %p1775_p11 }
  0x8e   :  { %1373 = vmatprep.subr.bf16.mxu1 %v1819_v1 }
  0x90   :  { %1392 = vmatpush3.bf16.msra.mxu0 %v2078_v24 }
  0x91   :  { %1374 = vmatpush3.bf16.msra.mxu1 %v2029_v17  ;;  %1393 = vmatprep.subr.bf16.mxu0 %v1819_v1 }
  0x92   :  { %1375 = vmatprep.subr.bf16.mxu1 %v1819_v1 }
  0x94   :  { %1394 = vmatpush3.bf16.msra.mxu0 %v2085_v25 }
  0x95   :  { %1376 = vmatpush3.bf16.msra.mxu1 %v2037_v18  ;;  %1395 = vmatprep.subr.bf16.mxu0 %v1819_v1 }
  0x96   :  { %1377 = vmatprep.subr.bf16.mxu1 %v1819_v1 }
  0x98   :  { %1396 = vmatpush3.bf16.msra.mxu0 %v2092_v26 }
  0x99   :  { %1378 = vmatpush3.bf16.msra.mxu1 %v2044_v19  ;;  %1397 = vmatprep.subr.bf16.mxu0 %v1819_v1 }
  0x9a   :  { %1379 = vmatprep.subr.bf16.mxu1 %v1819_v1 }
  0x9c   :  { %1398 = vmatpush3.bf16.msra.mxu0 %v2099_v27 }
  0x9d   :  { %1380 = vmatpush3.bf16.msra.mxu1 %v2051_v20  ;;  %1399 = vmatprep.subr.bf16.mxu0 %v1819_v1 }
  0x9e   :  { %1381 = vmatprep.subr.bf16.mxu1 %v1819_v1 }
  0xa0   :  { %1400 = vmatpush3.bf16.msra.mxu0 %v2117_v43 }
  0xa1   :  { %1382 = vmatpush3.bf16.msra.mxu1 %v2058_v21  ;;  %1401 = vmatprep.subr.bf16.mxu0 %v1819_v1 }
  0xa2   :  { %1407 = vmatprep.subr.bf16.mxu1 %v1819_v1 }
  0xa4   :  { %1402 = vmatpush3.bf16.msra.mxu0 %v2124_v44 }
  0xa5   :  { %1413 = vmatprep.subr.bf16.mxu0 %v1819_v1 }
 0x156   :  { %v230_v29 = vpop.f32.mrb[0].mxu0 }
 0x157   :  { %234 = vst [vmem:[#allocation2] sm:$0x1f] %v230_v29  ;;  %v1353_v30 = vpop.f32.mrb[1].mxu0  ;;  %v314_v31 = vpop.f32.mrb[0].mxu1 }
 0x158   :  { %v2107_v32 = vadd.f32 %v1197_v28, %v314_v31  ;;  %v1360_v33 = vpop.f32.mrb[1].mxu1 }
 0x15a   :  { %v362_v34 = vpop.f32.mrb[4].mxu0 }
 0x15b   :  { %v363_v35 = vadd.f32 %v362_v34, %v2107_v32  ;;  %v1365_v36 = vpop.f32.mrb[5].mxu0 }
 0x15c   :  { %v365_v37 = vpop.f32.mrb[6].mxu0 }
 0x15d   :  { %v1366_v38 = vpop.f32.mrb[7].mxu0 }
 0x15e   :  { %v1200_v39 = vld [vmem:[#allocation2 + $0x4] ss:$0 sm:$0xff]  ;;  %v1223_v9 = vld [vmem:[#allocation2 + $0x3] ss:$0 sm:$0xff] }
 0x15f   :  { %v373_v40 = vadd.f32 %v1200_v39, %v363_v35  ;;  %v716_v39 = vstv %s1224_s12 }
 0x161   :  { %v374_v41 = vmax.f32 %v373_v40, 0.0  ;;  %v718_v40 = vstv %s1225_s19 }
 0x163   :  { %v375_v42 = vpack.c.bf16 %v374_v41, %v374_v41  ;;  %v722_v41 = vld [vmem:[#allocation11 + $0x18] sm:$0xff] }
 0x165   :  { %1384 = vmatmul.mubr.bf16.vlgmr.msra.gmra.mrb[4].mxu1 %v375_v42  ;;  %v723_v42 = vstv %s1226_s20 }
 0x166   :  { %1408 = vmatpush3.bf16.msra.mxu1 %v1992_v12  ;;  %1409 = vmatprep.mubr.msk.bf16.mxu1 %vm1818_vm0, %v1819_v1 }
 0x167   :  { %1433 = vmatprep.subr.bf16.mxu1 %v1819_v1 }
 0x238   :  { %v464_v46 = vpop.f32.mrb[4].mxu1 }
 0x239   :  { %v465_v47 = vadd.f32 %v2128_v45, %v464_v46  ;;  %v1385_v48 = vpop.f32.mrb[5].mxu1 }
 0x23a   :  { %v467_v49 = vpop.f32.mrb[6].mxu1 }
 0x23b   :  { %v470_v50 = vmax.f32 %v465_v47, 0.0  ;;  %v1386_v51 = vpop.f32.mrb[7].mxu1 }
 0x23c   :  { %v724_v51 = vmul.f32 %v723_v42, %v722_v41 }
 0x23d   :  { %v471_v52 = vpack.c.bf16 %v470_v50, %v470_v50 }
 0x23f   :  { %1404 = vmatmul.mubr.bf16.vlgmr.msra.gmra.mrb[8].mxu0 %v471_v52 }
 0x240   :  { %1414 = vmatpush3.bf16.msra.mxu0 %v1997_v13  ;;  %1429 = vmatprep.mubr.msk.bf16.mxu0 %vm1818_vm0, %v1819_v1 }
 0x241   :  { %1415 = vmatprep.subr.bf16.mxu0 %v1819_v1 }
 0x244   :  { %1416 = vmatpush3.bf16.msra.mxu0 %v2005_v15 }
 0x245   :  { %1417 = vmatprep.subr.bf16.mxu0 %v1819_v1 }
 0x248   :  { %1418 = vmatpush3.bf16.msra.mxu0 %v2018_v16 }
 0x249   :  { %1419 = vmatprep.subr.bf16.mxu0 %v1819_v1 }
 0x24c   :  { %1420 = vmatpush3.bf16.msra.mxu0 %v2029_v17 }
 0x24d   :  { %1421 = vmatprep.subr.bf16.mxu0 %v1819_v1 }
 0x250   :  { %1422 = vmatpush3.bf16.msra.mxu0 %v2037_v18 }
 0x251   :  { %1423 = vmatprep.subr.bf16.mxu0 %v1819_v1 }
 0x254   :  { %1424 = vmatpush3.bf16.msra.mxu0 %v2044_v19 }
 0x255   :  { %1425 = vmatprep.subr.bf16.mxu0 %v1819_v1 }
 0x258   :  { %1426 = vmatpush3.bf16.msra.mxu0 %v2051_v20 }
 0x259   :  { %1427 = vmatprep.subr.bf16.mxu0 %v1819_v1 }
 0x25c   :  { %1428 = vmatpush3.bf16.msra.mxu0 %v2058_v21 }
 0x25d   :  { %1453 = vmatprep.subr.bf16.mxu0 %v1819_v1 }
 0x312   :  { %v560_v55 = vpop.f32.mrb[8].mxu0 }
 0x313   :  { %v561_v59 = vadd.f32 %v2152_v53, %v560_v55  ;;  %v1405_v61 = vpop.f32.mrb[9].mxu0 }
 0x314   :  { %v563_v62 = vpop.f32.mrb[10].mxu0 }
 0x315   :  { %v572_v63 = vmul.f32 %v571_v56, %v561_v59  ;;  %v1406_v2 = vpop.f32.mrb[11].mxu0 }
 0x317   :  { %v573_v3 = vsub.f32 %v570_v60, %v572_v63  ;;  %v1228_v60 = vld [vmem:[#allocation2 + $0x2] ss:$0 sm:$0xff] }
 0x319   :  { %v2156_v4 = vadd.f32 %v577_v0, %v573_v3 }
 0x31b   :  { %v579_v5 = vpack.c.bf16 %v2156_v4, %v2156_v4  ;;  %v717_v49 = vmul.f32 %v716_v39, %v2156_v4 }
 0x31d   :  { %1410 = vmatmul.mubr.msk.bf16.vlgmr.msra.gmra.mrb[8].mxu1 %vm320_vm3, %v579_v5 }
 0x31e   :  { %1434 = vmatpush3.bf16.msra.mxu1 %v2065_v22  ;;  %1449 = vmatprep.mubr.msk.bf16.mxu1 %vm1818_vm0, %v1819_v1 }
 0x31f   :  { %1435 = vmatprep.subr.bf16.mxu1 %v1819_v1 }
 0x322   :  { %1436 = vmatpush3.bf16.msra.mxu1 %v2071_v23 }
 0x323   :  { %1437 = vmatprep.subr.bf16.mxu1 %v1819_v1 }
 0x326   :  { %1438 = vmatpush3.bf16.msra.mxu1 %v2078_v24 }
 0x327   :  { %1439 = vmatprep.subr.bf16.mxu1 %v1819_v1 }
 0x32a   :  { %1440 = vmatpush3.bf16.msra.mxu1 %v2085_v25 }
 0x32b   :  { %1441 = vmatprep.subr.bf16.mxu1 %v1819_v1 }
 0x32e   :  { %1442 = vmatpush3.bf16.msra.mxu1 %v2092_v26 }
 0x32f   :  { %1443 = vmatprep.subr.bf16.mxu1 %v1819_v1 }
 0x332   :  { %1444 = vmatpush3.bf16.msra.mxu1 %v2099_v27 }
 0x333   :  { %1445 = vmatprep.subr.bf16.mxu1 %v1819_v1 }
 0x336   :  { %1446 = vmatpush3.bf16.msra.mxu1 %v2117_v43 }
 0x337   :  { %1447 = vmatprep.subr.bf16.mxu1 %v1819_v1 }
 0x33a   :  { %1448 = vmatpush3.bf16.msra.mxu1 %v2124_v44 }
 0x33b   :  { %1459 = vmatprep.subr.bf16.mxu1 %v1819_v1 }
 0x3f0   :  { %v617_v6 = vpop.f32.mrb[8].mxu1 }
 0x3f1   :  { %v618_v7 = vadd.f32 %v617_v6, %v2107_v32  ;;  %v1411_v8 = vpop.f32.mrb[9].mxu1 }
 0x3f2   :  { %v620_v10 = vpop.f32.mrb[10].mxu1 }
 0x3f3   :  { %v628_v11 = vadd.f32 %v1223_v9, %v618_v7  ;;  %v1412_v14 = vpop.f32.mrb[11].mxu1 }
 0x3f4   :  { %v865_v14 = vstv %s1230_s1 }
 0x3f5   :  { %v629_v28 = vmax.f32 %v628_v11, 0.0  ;;  %v863_v11 = vstv %s1229_s22 }
 0x3f7   :  { %v630_v29 = vpack.c.bf16 %v629_v28, %v629_v28  ;;  %v869_v28 = vld [vmem:[#allocation11 + $0x10] sm:$0xff] }
 0x3f9   :  { %1430 = vmatmul.mubr.bf16.vlgmr.msra.gmra.mrb[12].mxu0 %v630_v29  ;;  %v870_v29 = vstv %s1231_s21 }
 0x3fa   :  { %1454 = vmatpush3.bf16.msra.mxu0 %v1992_v12  ;;  %1455 = vmatprep.mubr.msk.bf16.mxu0 %vm1818_vm0, %v1819_v1 }
 0x3fb   :  { %1479 = vmatprep.subr.bf16.mxu0 %v1819_v1 }
 0x4cc   :  { %v665_v30 = vpop.f32.mrb[12].mxu0 }
 0x4cd   :  { %v666_v31 = vadd.f32 %v2128_v45, %v665_v30  ;;  %v1431_v33 = vpop.f32.mrb[13].mxu0 }
 0x4ce   :  { %v668_v34 = vpop.f32.mrb[14].mxu0 }
 0x4cf   :  { %v671_v35 = vmax.f32 %v666_v31, 0.0  ;;  %v1432_v36 = vpop.f32.mrb[15].mxu0 }
 0x4d0   :  { %v871_v36 = vmul.f32 %v870_v29, %v869_v28  ;;  %v1162_v28 = vld [vmem:[#allocation11] sm:$0xff]  ;;  %v1163_v29 = vstv %s1240_s9 }
 0x4d1   :  { %v672_v37 = vpack.c.bf16 %v671_v35, %v671_v35 }
 0x4d3   :  { %1450 = vmatmul.mubr.bf16.vlgmr.msra.gmra.mrb[12].mxu1 %v672_v37 }
 0x4d4   :  { %1460 = vmatpush3.bf16.msra.mxu1 %v1997_v13  ;;  %1475 = vmatprep.mubr.msk.bf16.mxu1 %vm1818_vm0, %v1819_v1 }
 0x4d5   :  { %1461 = vmatprep.subr.bf16.mxu1 %v1819_v1 }
 0x4d8   :  { %1462 = vmatpush3.bf16.msra.mxu1 %v2005_v15 }
 0x4d9   :  { %1463 = vmatprep.subr.bf16.mxu1 %v1819_v1 }
 0x4dc   :  { %1464 = vmatpush3.bf16.msra.mxu1 %v2018_v16 }
 0x4dd   :  { %1465 = vmatprep.subr.bf16.mxu1 %v1819_v1 }
 0x4e0   :  { %1466 = vmatpush3.bf16.msra.mxu1 %v2029_v17 }
 0x4e1   :  { %1467 = vmatprep.subr.bf16.mxu1 %v1819_v1 }
 0x4e4   :  { %1468 = vmatpush3.bf16.msra.mxu1 %v2037_v18 }
 0x4e5   :  { %1469 = vmatprep.subr.bf16.mxu1 %v1819_v1 }
 0x4e8   :  { %1470 = vmatpush3.bf16.msra.mxu1 %v2044_v19 }
 0x4e9   :  { %1471 = vmatprep.subr.bf16.mxu1 %v1819_v1 }
 0x4ec   :  { %1472 = vmatpush3.bf16.msra.mxu1 %v2051_v20 }
 0x4ed   :  { %1473 = vmatprep.subr.bf16.mxu1 %v1819_v1 }
 0x4f0   :  { %1474 = vmatpush3.bf16.msra.mxu1 %v2058_v21 }
 0x4f1   :  { %1499 = vmatprep.subr.bf16.mxu1 %v1819_v1 }
 0x5a6   :  { %v707_v38 = vpop.f32.mrb[12].mxu1 }
 0x5a7   :  { %v708_v46 = vadd.f32 %v2152_v53, %v707_v38  ;;  %v1451_v47 = vpop.f32.mrb[13].mxu1 }
 0x5a8   :  { %v710_v48 = vpop.f32.mrb[14].mxu1  ;;  %v1233_v47 = vld [vmem:[#allocation2 + $0x1] ss:$0 sm:$0xff] }
 0x5a9   :  { %v719_v50 = vmul.f32 %v718_v40, %v708_v46  ;;  %v1452_v52 = vpop.f32.mrb[15].mxu1 }
 0x5ab   :  { %v720_v54 = vsub.f32 %v717_v49, %v719_v50 }
 0x5ad   :  { %v2205_v55 = vadd.f32 %v724_v51, %v720_v54 }
 0x5af   :  { %v726_v56 = vpack.c.bf16 %v2205_v55, %v2205_v55  ;;  %v864_v34 = vmul.f32 %v863_v11, %v2205_v55 }
 0x5b1   :  { %1456 = vmatmul.mubr.msk.bf16.vlgmr.msra.gmra.mrb[16].mxu0 %vm320_vm3, %v726_v56 }
 0x5b2   :  { %1480 = vmatpush3.bf16.msra.mxu0 %v2065_v22  ;;  %1495 = vmatprep.mubr.msk.bf16.mxu0 %vm1818_vm0, %v1819_v1 }
 0x5b3   :  { %1481 = vmatprep.subr.bf16.mxu0 %v1819_v1 }
 0x5b6   :  { %1482 = vmatpush3.bf16.msra.mxu0 %v2071_v23 }
 0x5b7   :  { %1483 = vmatprep.subr.bf16.mxu0 %v1819_v1 }
 0x5ba   :  { %1484 = vmatpush3.bf16.msra.mxu0 %v2078_v24 }
 0x5bb   :  { %1485 = vmatprep.subr.bf16.mxu0 %v1819_v1 }
 0x5be   :  { %1486 = vmatpush3.bf16.msra.mxu0 %v2085_v25 }
 0x5bf   :  { %1487 = vmatprep.subr.bf16.mxu0 %v1819_v1 }
 0x5c2   :  { %1488 = vmatpush3.bf16.msra.mxu0 %v2092_v26 }
 0x5c3   :  { %1489 = vmatprep.subr.bf16.mxu0 %v1819_v1 }
 0x5c6   :  { %1490 = vmatpush3.bf16.msra.mxu0 %v2099_v27 }
 0x5c7   :  { %1491 = vmatprep.subr.bf16.mxu0 %v1819_v1 }
 0x5ca   :  { %1492 = vmatpush3.bf16.msra.mxu0 %v2117_v43 }
 0x5cb   :  { %1493 = vmatprep.subr.bf16.mxu0 %v1819_v1 }
 0x5ce   :  { %1494 = vmatpush3.bf16.msra.mxu0 %v2124_v44 }
 0x5cf   :  { %1505 = vmatprep.subr.bf16.mxu0 %v1819_v1 }
 0x684   :  { %v764_v57 = vpop.f32.mrb[16].mxu0 }
 0x685   :  { %v765_v58 = vadd.f32 %v764_v57, %v2107_v32  ;;  %v1457_v59 = vpop.f32.mrb[17].mxu0 }
 0x686   :  { %v767_v61 = vpop.f32.mrb[18].mxu0 }
 0x687   :  { %v775_v62 = vadd.f32 %v1228_v60, %v765_v58  ;;  %v1458_v63 = vpop.f32.mrb[19].mxu0 }
 0x689   :  { %v776_v0 = vmax.f32 %v775_v62, 0.0 }
 0x68b   :  { %v777_v2 = vpack.c.bf16 %v776_v0, %v776_v0 }
 0x68d   :  { %1476 = vmatmul.mubr.bf16.vlgmr.msra.gmra.mrb[16].mxu1 %v777_v2 }
 0x68e   :  { %1500 = vmatpush3.bf16.msra.mxu1 %v1992_v12  ;;  %1501 = vmatprep.mubr.msk.bf16.mxu1 %vm1818_vm0, %v1819_v1 }
 0x68f   :  { %1525 = vmatprep.subr.bf16.mxu1 %v1819_v1 }
 0x760   :  { %v812_v3 = vpop.f32.mrb[16].mxu1 }
 0x761   :  { %v813_v4 = vadd.f32 %v2128_v45, %v812_v3  ;;  %v1477_v5 = vpop.f32.mrb[17].mxu1 }
 0x762   :  { %v815_v6 = vpop.f32.mrb[18].mxu1 }
 0x763   :  { %v818_v7 = vmax.f32 %v813_v4, 0.0  ;;  %v1478_v8 = vpop.f32.mrb[19].mxu1 }
 0x765   :  { %v819_v9 = vpack.c.bf16 %v818_v7, %v818_v7 }
 0x767   :  { %1496 = vmatmul.mubr.bf16.vlgmr.msra.gmra.mrb[20].mxu0 %v819_v9 }
 0x768   :  { %1506 = vmatpush3.bf16.msra.mxu0 %v1997_v13  ;;  %1521 = vmatprep.mubr.msk.bf16.mxu0 %vm1818_vm0, %v1819_v1 }
 0x769   :  { %1507 = vmatprep.subr.bf16.mxu0 %v1819_v1 }
 0x76c   :  { %1508 = vmatpush3.bf16.msra.mxu0 %v2005_v15 }
 0x76d   :  { %1509 = vmatprep.subr.bf16.mxu0 %v1819_v1 }
 0x770   :  { %1510 = vmatpush3.bf16.msra.mxu0 %v2018_v16 }
 0x771   :  { %1511 = vmatprep.subr.bf16.mxu0 %v1819_v1 }
 0x774   :  { %1512 = vmatpush3.bf16.msra.mxu0 %v2029_v17 }
 0x775   :  { %1513 = vmatprep.subr.bf16.mxu0 %v1819_v1 }
 0x778   :  { %1514 = vmatpush3.bf16.msra.mxu0 %v2037_v18 }
 0x779   :  { %1515 = vmatprep.subr.bf16.mxu0 %v1819_v1 }
 0x77c   :  { %1516 = vmatpush3.bf16.msra.mxu0 %v2044_v19 }
 0x77d   :  { %1517 = vmatprep.subr.bf16.mxu0 %v1819_v1 }
 0x780   :  { %1518 = vmatpush3.bf16.msra.mxu0 %v2051_v20 }
 0x781   :  { %1519 = vmatprep.subr.bf16.mxu0 %v1819_v1 }
 0x784   :  { %1520 = vmatpush3.bf16.msra.mxu0 %v2058_v21 }
 0x785   :  { %1545 = vmatprep.subr.bf16.mxu0 %v1819_v1 }
 0x83a   :  { %v854_v10 = vpop.f32.mrb[20].mxu0 }
 0x83b   :  { %v855_v30 = vadd.f32 %v2152_v53, %v854_v10  ;;  %v1497_v31 = vpop.f32.mrb[21].mxu0 }
 0x83c   :  { %v857_v33 = vpop.f32.mrb[22].mxu0 }
 0x83d   :  { %v866_v35 = vmul.f32 %v865_v14, %v855_v30  ;;  %v1498_v37 = vpop.f32.mrb[23].mxu0  ;;  %v1157_v14 = vstv %s1154_s10 }
 0x83f   :  { %v867_v38 = vsub.f32 %v864_v34, %v866_v35 }
 0x841   :  { %v2254_v39 = vadd.f32 %v871_v36, %v867_v38  ;;  %v1164_v36 = vmul.f32 %v1163_v29, %v1162_v28 }
 0x843   :  { %v873_v40 = vpack.c.bf16 %v2254_v39, %v2254_v39 }
 0x845   :  { %1502 = vmatmul.mubr.msk.bf16.vlgmr.msra.gmra.mrb[20].mxu1 %vm320_vm3, %v873_v40 }
 0x846   :  { %1526 = vmatpush3.bf16.msra.mxu1 %v2065_v22  ;;  %1541 = vmatprep.mubr.msk.bf16.mxu1 %vm1818_vm0, %v1819_v1 }
 0x847   :  { %1527 = vmatprep.subr.bf16.mxu1 %v1819_v1 }
 0x84a   :  { %1528 = vmatpush3.bf16.msra.mxu1 %v2071_v23 }
 0x84b   :  { %1529 = vmatprep.subr.bf16.mxu1 %v1819_v1 }
 0x84e   :  { %1530 = vmatpush3.bf16.msra.mxu1 %v2078_v24 }
 0x84f   :  { %1531 = vmatprep.subr.bf16.mxu1 %v1819_v1 }
 0x852   :  { %1532 = vmatpush3.bf16.msra.mxu1 %v2085_v25 }
 0x853   :  { %1533 = vmatprep.subr.bf16.mxu1 %v1819_v1 }
 0x856   :  { %1534 = vmatpush3.bf16.msra.mxu1 %v2092_v26 }
 0x857   :  { %1535 = vmatprep.subr.bf16.mxu1 %v1819_v1 }
 0x85a   :  { %1536 = vmatpush3.bf16.msra.mxu1 %v2099_v27 }
 0x85b   :  { %1537 = vmatprep.subr.bf16.mxu1 %v1819_v1 }
 0x85e   :  { %1538 = vmatpush3.bf16.msra.mxu1 %v2117_v43 }
 0x85f   :  { %1539 = vmatprep.subr.bf16.mxu1 %v1819_v1 }
 0x862   :  { %1540 = vmatpush3.bf16.msra.mxu1 %v2124_v44 }
 0x863   :  { %1551 = vmatprep.subr.bf16.mxu1 %v1819_v1 }
 0x918   :  { %v911_v41 = vpop.f32.mrb[20].mxu1 }
 0x919   :  { %v912_v42 = vadd.f32 %v911_v41, %v2107_v32  ;;  %v1503_v46 = vpop.f32.mrb[21].mxu1 }
 0x91a   :  { %v914_v48 = vpop.f32.mrb[22].mxu1 }
 0x91b   :  { %v922_v49 = vadd.f32 %v1233_v47, %v912_v42  ;;  %v1504_v50 = vpop.f32.mrb[23].mxu1 }
 0x91d   :  { %v923_v51 = vmax.f32 %v922_v49, 0.0 }
 0x91f   :  { %v924_v52 = vpack.c.bf16 %v923_v51, %v923_v51 }
 0x921   :  { %1522 = vmatmul.mubr.bf16.vlgmr.msra.gmra.mrb[24].mxu0 %v924_v52 }
 0x922   :  { %1546 = vmatpush3.bf16.msra.mxu0 %v1992_v12  ;;  %1547 = vmatprep.mubr.msk.bf16.mxu0 %vm1818_vm0, %v1819_v1 }
 0x923   :  { %1571 = vmatprep.subr.bf16.mxu0 %v1819_v1 }
 0x9f4   :  { %v959_v54 = vpop.f32.mrb[24].mxu0 }
 0x9f5   :  { %v960_v55 = vadd.f32 %v2128_v45, %v959_v54  ;;  %v1523_v56 = vpop.f32.mrb[25].mxu0 }
 0x9f6   :  { %v962_v57 = vpop.f32.mrb[26].mxu0 }
 0x9f7   :  { %v965_v58 = vmax.f32 %v960_v55, 0.0  ;;  %v1524_v59 = vpop.f32.mrb[27].mxu0 }
 0x9f9   :  { %v966_v60 = vpack.c.bf16 %v965_v58, %v965_v58 }
 0x9fb   :  { %1542 = vmatmul.mubr.bf16.vlgmr.msra.gmra.mrb[24].mxu1 %v966_v60 }
 0x9fc   :  { %1552 = vmatpush3.bf16.msra.mxu1 %v1997_v13  ;;  %1567 = vmatprep.mubr.msk.bf16.mxu1 %vm1818_vm0, %v1819_v1  ;;  %v1010_v13 = vstv %s1234_s24 }
 0x9fd   :  { %1553 = vmatprep.subr.bf16.mxu1 %v1819_v1  ;;  %v1011_v62 = vmul.f32 %v1010_v13, %v2254_v39 }
 0xa00   :  { %1554 = vmatpush3.bf16.msra.mxu1 %v2005_v15  ;;  %v1012_v15 = vstv %s1235_s5 }
 0xa01   :  { %1555 = vmatprep.subr.bf16.mxu1 %v1819_v1 }
 0xa04   :  { %1556 = vmatpush3.bf16.msra.mxu1 %v2018_v16  ;;  %v1016_v16 = vld [vmem:[#allocation11 + $0x8] sm:$0xff] }
 0xa05   :  { %1557 = vmatprep.subr.bf16.mxu1 %v1819_v1 }
 0xa08   :  { %1558 = vmatpush3.bf16.msra.mxu1 %v2029_v17  ;;  %v1017_v17 = vstv %s1236_s25 }
 0xa09   :  { %1559 = vmatprep.subr.bf16.mxu1 %v1819_v1 }
 0xa0c   :  { %1560 = vmatpush3.bf16.msra.mxu1 %v2037_v18 }
 0xa0d   :  { %1561 = vmatprep.subr.bf16.mxu1 %v1819_v1 }
 0xa10   :  { %1562 = vmatpush3.bf16.msra.mxu1 %v2044_v19 }
 0xa11   :  { %1563 = vmatprep.subr.bf16.mxu1 %v1819_v1 }
 0xa14   :  { %1564 = vmatpush3.bf16.msra.mxu1 %v2051_v20  ;;  %v1018_v20 = vmul.f32 %v1017_v17, %v1016_v16 }
 0xa15   :  { %1565 = vmatprep.subr.bf16.mxu1 %v1819_v1 }
 0xa18   :  { %1566 = vmatpush3.bf16.msra.mxu1 %v2058_v21 }
 0xace   :  { %v1001_v12 = vpop.f32.mrb[24].mxu1 }
 0xacf   :  { %v1002_v18 = vadd.f32 %v2152_v53, %v1001_v12  ;;  %v1543_v61 = vpop.f32.mrb[25].mxu1 }
 0xad0   :  { %v1004_v19 = vpop.f32.mrb[26].mxu1 }
 0xad1   :  { %v1013_v63 = vmul.f32 %v1012_v15, %v1002_v18  ;;  %v1544_v0 = vpop.f32.mrb[27].mxu1 }
 0xad3   :  { %v1014_v2 = vsub.f32 %v1011_v62, %v1013_v63 }
 0xad5   :  { %v1019_v3 = vadd.f32 %v1018_v20, %v1014_v2 }
 0xad7   :  { %v1020_v21 = vpack.c.bf16 %v1019_v3, %v1019_v3  ;;  %v1158_v35 = vmul.f32 %v1157_v14, %v1019_v3 }
 0xad9   :  { %1548 = vmatmul.mubr.msk.bf16.vlgmr.msra.gmra.mrb[28].mxu0 %vm320_vm3, %v1020_v21 }
 0xada   :  { %1572 = vmatpush3.bf16.msra.mxu0 %v2065_v22  ;;  %1587 = vmatprep.mubr.msk.bf16.mxu0 %vm1818_vm0, %v1819_v1 }
 0xadb   :  { %1573 = vmatprep.subr.bf16.mxu0 %v1819_v1 }
 0xade   :  { %1574 = vmatpush3.bf16.msra.mxu0 %v2071_v23 }
 0xadf   :  { %1575 = vmatprep.subr.bf16.mxu0 %v1819_v1 }
 0xae2   :  { %1576 = vmatpush3.bf16.msra.mxu0 %v2078_v24 }
 0xae3   :  { %1577 = vmatprep.subr.bf16.mxu0 %v1819_v1 }
 0xae6   :  { %1578 = vmatpush3.bf16.msra.mxu0 %v2085_v25  ;;  %v1238_v25 = vld [vmem:[#allocation2] ss:$0 sm:$0xff] }
 0xae7   :  { %1579 = vmatprep.subr.bf16.mxu0 %v1819_v1 }
 0xaea   :  { %1580 = vmatpush3.bf16.msra.mxu0 %v2092_v26 }
 0xaeb   :  { %1581 = vmatprep.subr.bf16.mxu0 %v1819_v1 }
 0xaee   :  { %1582 = vmatpush3.bf16.msra.mxu0 %v2099_v27 }
 0xaef   :  { %1583 = vmatprep.subr.bf16.mxu0 %v1819_v1 }
 0xaf2   :  { %1584 = vmatpush3.bf16.msra.mxu0 %v2117_v43 }
 0xaf3   :  { %1585 = vmatprep.subr.bf16.mxu0 %v1819_v1 }
 0xaf6   :  { %1586 = vmatpush3.bf16.msra.mxu0 %v2124_v44  ;;  %v1159_v44 = vstv %s1239_s26 }
 0xbac   :  { %v1058_v22 = vpop.f32.mrb[28].mxu0 }
 0xbad   :  { %v1059_v23 = vadd.f32 %v1058_v22, %v2107_v32  ;;  %v1549_v24 = vpop.f32.mrb[29].mxu0 }
 0xbae   :  { %v1061_v4 = vpop.f32.mrb[30].mxu0 }
 0xbaf   :  { %v1069_v5 = vadd.f32 %v1238_v25, %v1059_v23  ;;  %v1550_v26 = vpop.f32.mrb[31].mxu0 }
 0xbb1   :  { %v1070_v6 = vmax.f32 %v1069_v5, 0.0 }
 0xbb3   :  { %v1071_v7 = vpack.c.bf16 %v1070_v6, %v1070_v6 }
 0xbb5   :  { %1568 = vmatmul.mubr.bf16.vlgmr.msra.gmra.mrb[28].mxu1 %v1071_v7 }
 0xc88   :  { %v1106_v27 = vpop.f32.mrb[28].mxu1 }
 0xc89   :  { %v1107_v8 = vadd.f32 %v2128_v45, %v1106_v27  ;;  %v1569_v9 = vpop.f32.mrb[29].mxu1 }
 0xc8a   :  { %v1109_v43 = vpop.f32.mrb[30].mxu1 }
 0xc8b   :  { %v1112_v10 = vmax.f32 %v1107_v8, 0.0  ;;  %v1570_v1 = vpop.f32.mrb[31].mxu1 }
 0xc8d   :  { %v1113_v11 = vpack.c.bf16 %v1112_v10, %v1112_v10 }
 0xc8f   :  { %1588 = vmatmul.mubr.bf16.vlgmr.msra.gmra.mrb[32].mxu0 %v1113_v11 }
 0xd62   :  { %v1148_v32 = vpop.f32.mrb[32].mxu0 }
 0xd63   :  { %v1149_v30 = vadd.f32 %v2152_v53, %v1148_v32  ;;  %v1589_v31 = vpop.f32.mrb[33].mxu0 }
 0xd64   :  { %v1151_v33 = vpop.f32.mrb[34].mxu0 }
 0xd65   :  { %v1160_v34 = vmul.f32 %v1159_v44, %v1149_v30  ;;  %v1590_v45 = vpop.f32.mrb[35].mxu0 }
 0xd67   :  { %v1161_v37 = vsub.f32 %v1158_v35, %v1160_v34 }
 0xd69   :  { %v1165_v38 = vadd.f32 %v1164_v36, %v1161_v37 }
 0xd6b   :  { %v1166_v39 = vsel %vm320_vm3, %v1165_v38, -inf }
 0xd6c   :  { %1167 = vmax.xlane.f32.xlu0 %v1166_v39 }
 0xdf9   :  { %v1168_v40 = vpop.xlane.xlu0 %1167 }
 0xdfa   :  { %v1169_v41 = vsub.f32 %v1165_v38, %v1168_v40 }
 0xdfc   :  { %v1170_v42 = vmul.f32 1.442695, %v1169_v41 }
 0xdfe   :  { %1626 = vpow2.f32 %v1170_v42 }
 0xe08   :  { %v1627_v46 = vpop.eup %1626 }
 0xe09   :  { %v1172_v47 = vsel %vm320_vm3, %v1627_v46, 0.0 }
 0xe0a   :  { %1173 = vadd.xlane.f32.xlu0 %v1172_v47 }
 0xe97   :  { %v1174_v53 = vpop.xlane.xlu0 %1173 }
 0xe98   :  { %1628 = vrcp.f32 %v1174_v53 }
 0xea2   :  { %v1629_v48 = vpop.eup %1628 }
 0xea3   :  { %v1176_v49 = vmul.f32 %v1629_v48, %v1627_v46 }
 0xea5   :  { %1177 = vst.msk [vmem:[#allocation16] sm:$0xff] %vm320_vm3, %v1176_v49 }
 0xea6   :  { %1785 = shalt.err (!%p1782_p1)
}
 0xea7   :  { %s1786_s15 = scalar_lea.hbm %s2351_s13, 128 }
 0xea8   :  { %p1787_p2 = scmp.ne.s32.totalorder %s2351_s13, %s1786_s15  ;;  %p1790_p3 = scmp.lt.u32.totalorder %s1786_s15, %s2351_s13 }
 0xeaa   :  { %p1792_p4 = pnand %p1790_p3, %p1787_p2 }
 0xeac   :  { %1795 = shalt.err (!%p1792_p4)
}
 0xead   :  { %1187 = dma.vmem_to_hbm [thread:$0]  %s1185_s28, 128, %s2351_s13, [#allocation7]  }
 0xeae   :  { %1806 = dma.done.wait [#allocation7], 128  }
 0xeaf   :  { %1807 = vsyncadd [#allocation7], 4294967168 }
 0xeb0   :  { %1191 = vsyncpa [#allocation6], 1 }
 0xeb1   :  { %1192 = vsyncpa [#allocation9], 1 }
 0xeb2   :  { %1193 = vsyncpa [#allocation12], 1 }
 0xeb3   :  { %1194 = vsyncpa [#allocation15], 1 }
 0xeb4   :  { %1195 = vsyncpa [#allocation7], 1 }

</bundles_post_ra>
